<compile_context>
chip_gen: v7x
topology: tpu7x:2x2x1
jax: 0.10.0
libtpu: 0.0.40
codegen_flags: <defaults>
</compile_context>

<pallas_src>
import jax
import jax.numpy as jnp
from jax.experimental import pallas as pl
from jax.experimental.pallas import tpu as pltpu

LANES = 128


def _round_up(n, m):
    return ((n + m - 1) // m) * m


def mlp_kernel(x_ref, w1_ref, b1_ref, w2_ref, b2_ref, w3_ref, b3_ref,
               w4_ref, b4_ref, out_ref):
    bt = x_ref.shape[0]                                   # multiple of 128 (wrapper guarantee)
    # encode[0]: Linear(x_dim, 512) + ReLU (+ Dropout(0) == identity)
    x = x_ref[...].astype(jnp.bfloat16)                   # bf16 MXU operands, f32 accumulate
    h = jnp.dot(x, w1_ref[...], preferred_element_type=jnp.float32) + b1_ref[...]
    h = jnp.maximum(h, 0.0).astype(jnp.bfloat16)
    # encode[1]: Linear(512, 256) + ReLU (+ Dropout(0) == identity)
    h = jnp.dot(h, w2_ref[...], preferred_element_type=jnp.float32) + b2_ref[...]
    h = jnp.maximum(h, 0.0).astype(jnp.bfloat16)
    # encode[2]: Linear(256, z_dim)  (w3/b3 zero-padded to z_pad lanes)
    z = jnp.dot(h, w3_ref[...], preferred_element_type=jnp.float32) + b3_ref[...]
    # classifier: ReLU -> Linear(z_dim, 1)
    z = jnp.maximum(z, 0.0)                               # padded columns stay exactly 0
    # N=1 matmul would waste the MXU; do it on the VPU + XLU lane reduce instead.
    zw = z * w4_ref[...]                                  # (bt, z_pad) f32
    zw = zw.reshape(bt // LANES, LANES, zw.shape[-1])     # split major axis (layout no-op)
    logit = jnp.sum(zw, axis=-1) + b4_ref[0, 0]           # (bt/128, 128) lane-dense, b4 folded in
    out_ref[...] = logit.reshape(out_ref.shape).astype(out_ref.dtype)


def mlp_forward(x, params, *, batch_tile=None):
    """x: (B, x_dim) in its native dtype (f32 or bf16).
    params: w{1..4} stored (in, out), b{1..4} stored (1, out)."""
    B, x_dim = x.shape
    z_dim = params["w3"].shape[1]
    z_pad = _round_up(max(z_dim, 1), LANES)

    # Pad the batch to a multiple of 128 so logits pack exactly into 128 lanes.
    B_pad = _round_up(B, LANES)
    x_in = x if B_pad == B else jnp.pad(x, ((0, B_pad - B), (0, 0)))

    f32, bf16 = jnp.float32, jnp.bfloat16
    # Weights feed the MXU -> bf16; biases stay f32 (bias/ReLU done in f32).
    w1 = params["w1"].astype(bf16)
    b1 = params["b1"].astype(f32).reshape(1, -1)
    w2 = params["w2"].astype(bf16)
    b2 = params["b2"].astype(f32).reshape(1, -1)
    # Pad the z dimension to a multiple of 128 lanes; zero weight/bias columns stay
    # zero through ReLU and contribute nothing to the final reduce.
    w3 = jnp.zeros((params["w3"].shape[0], z_pad), bf16).at[:, :z_dim].set(params["w3"].astype(bf16))
    b3 = jnp.zeros((1, z_pad), f32).at[:, :z_dim].set(params["b3"].astype(f32).reshape(1, z_dim))
    # Final Linear(z_dim, 1): padded (1, z_pad) f32 row for the VPU reduce; bias as SMEM scalar.
    w4 = jnp.zeros((1, z_pad), f32).at[:, :z_dim].set(params["w4"].astype(f32).reshape(1, z_dim))
    b4 = params["b4"].astype(f32).reshape(1, 1)

    # --- generation-aware sizing -------------------------------------------------
    vmem_cap = 64 * 1024 * 1024  # conservative fallback (v7x physical VMEM per TC)
    try:
        vmem_cap = int(pltpu.get_tpu_info().vmem_capacity_bytes)
    except Exception:
        pass

    x_itemsize = jnp.dtype(x.dtype).itemsize
    single_buffer_w1 = (w1.size * 2) >= (2 << 20)  # large w1: don't double-buffer (grid-invariant)
    w_bytes = ((1 if single_buffer_w1 else 2) * w1.size * 2
               + 2 * (w2.size + w3.size) * 2
               + 2 * (b1.size + b2.size + b3.size + w4.size) * 4)

    def tile_bytes(bt):
        # per-tile VMEM: double-buffered x tile + in-kernel temporaries + packed output
        return (2 * bt * x_dim * x_itemsize          # pipelined x tile
                + bt * x_dim * 2                     # bf16 copy of x
                + bt * 512 * (4 + 2)                 # h1 f32 + bf16
                + bt * 256 * (4 + 2)                 # h2 f32 + bf16
                + bt * z_pad * (4 + 4)               # z f32 + z*w4 f32
                + 2 * bt * 4)                        # pipelined packed output

    if batch_tile is None:
        cap = int(0.6 * vmem_cap) - w_bytes          # leave headroom for compiler scratch
        cands = [c for c in (2048, 1024, 512, 384, 256, 128)
                 if B_pad % c == 0 and tile_bytes(c) <= cap]
        for want_steps in (4, 2, 1):                 # prefer >=4 grid steps (v7x megacore)
            picked = next((c for c in cands if B_pad >= want_steps * c), None)
            if picked is not None:
                batch_tile = picked
                break
        if batch_tile is None:
            # TODO(synk): for very wide inputs (w1/x tile alone exceeding VMEM) add a K
            # grid axis over x_dim with an f32 accumulator instead of one-shot layer 1.
            batch_tile = 128
    assert batch_tile % LANES == 0 and B_pad % batch_tile == 0, \
        "batch_tile must be a multiple of 128 dividing the padded batch"

    num_steps = B_pad // batch_tile
    out_rows = batch_tile // LANES

    budget = tile_bytes(batch_tile) + w_bytes
    vmem_limit = None
    if budget > 12 * 1024 * 1024:                    # approaching the 16 MiB (v5e) scoped default
        vmem_limit = max(min(int(budget * 1.4), int(vmem_cap * 0.85)), budget)

    def const_spec(arr, single_buffer=False):
        # grid-invariant parameter: same block every step (DMA'd once)
        if single_buffer:
            return pl.BlockSpec(arr.shape, lambda i: (0, 0), pipeline_mode=pl.Buffered(1))
        return pl.BlockSpec(arr.shape, lambda i: (0, 0))

    out_packed = pl.pallas_call(
        mlp_kernel,
        out_shape=jax.ShapeDtypeStruct((num_steps, out_rows, LANES), jnp.float32),
        grid_spec=pltpu.PrefetchScalarGridSpec(
            num_scalar_prefetch=0,
            grid=(num_steps,),
            in_specs=[
                pl.BlockSpec((batch_tile, x_dim), lambda i: (i, 0)),
                const_spec(w1, single_buffer_w1), const_spec(b1),
                const_spec(w2), const_spec(b2),
                const_spec(w3), const_spec(b3),
                const_spec(w4),
                pl.BlockSpec(memory_space=pltpu.MemorySpace.SMEM),   # b4 scalar
            ],
            out_specs=pl.BlockSpec((1, out_rows, LANES), lambda i: (i, 0, 0)),
        ),
        compiler_params=pltpu.CompilerParams(
            dimension_semantics=("parallel",),
            vmem_limit_bytes=vmem_limit,
        ),
    )(x_in, w1, b1, w2, b2, w3, b3, w4, b4)

    # Row-major unpack: (step, row, lane) -> batch index step*batch_tile + row*128 + lane.
    logits = out_packed.reshape(B_pad, 1)[:B]
    return {"logits": logits}


def init_params(key, x_dim, z_dim):
    """Deterministic init matching nn.Linear's U(-1/sqrt(in), 1/sqrt(in)) convention."""
    h_dims = [x_dim, 512, 256, z_dim, 1]  # last layer is the classifier head
    params = {}
    for idx, (fin, fout) in enumerate(zip(h_dims[:-1], h_dims[1:]), start=1):
        key, kw, kb = jax.random.split(key, 3)
        bound = 1.0 / jnp.sqrt(jnp.float32(fin))
        # stored as (in, out) so the kernel can do x @ W (transpose of torch's (out, in))
        params[f"w{idx}"] = jax.random.uniform(kw, (fin, fout), jnp.float32, -bound, bound)
        params[f"b{idx}"] = jax.random.uniform(kb, (1, fout), jnp.float32, -bound, bound)
    return params


def mlp_reference(x, params):
    h = jnp.maximum(x @ params["w1"] + params["b1"], 0.0)
    h = jnp.maximum(h @ params["w2"] + params["b2"], 0.0)
    z = h @ params["w3"] + params["b3"]
    z = jnp.maximum(z, 0.0)
    return z @ params["w4"] + params["b4"]


if __name__ == "__main__":
    key = jax.random.PRNGKey(0)

    def run_case(case_key, batch, x_dim, z_dim):
        kx, kp = jax.random.split(case_key)
        x = jax.random.normal(kx, (batch, x_dim), jnp.float32)
        params = init_params(kp, x_dim, z_dim)
        out = mlp_forward(x, params)
        logits = jax.block_until_ready(out["logits"])
        assert logits.shape == (batch, 1)
        ref = mlp_reference(x, params)
        # tolerance loosened vs the f32 reference: matmul operands are bf16 (f32 accumulation)
        assert jnp.allclose(logits, ref, atol=5e-2, rtol=5e-2), \
            f"mismatch vs reference (B={batch}, x_dim={x_dim}, z_dim={z_dim})"

    k1, k2 = jax.random.split(key)
    run_case(k1, batch=8, x_dim=32, z_dim=32)     # batch padded to 128, single grid step
    run_case(k2, batch=512, x_dim=64, z_dim=20)   # 4 parallel grid steps of 128 rows

    print("KERNEL_OK")
</pallas_src>

<mosaic_0001>
module attributes {stable_mosaic.version = 11 : i64} {
  func.func @mlp_kernel(%arg0: i32, %arg1: memref<128x32xf32, #tpu.memory_space<vmem>>, %arg2: memref<32x512xbf16, #tpu.memory_space<vmem>>, %arg3: memref<1x512xf32, #tpu.memory_space<vmem>>, %arg4: memref<512x256xbf16, #tpu.memory_space<vmem>>, %arg5: memref<1x256xf32, #tpu.memory_space<vmem>>, %arg6: memref<256x128xbf16, #tpu.memory_space<vmem>>, %arg7: memref<1x128xf32, #tpu.memory_space<vmem>>, %arg8: memref<1x128xf32, #tpu.memory_space<vmem>>, %arg9: memref<1x1xf32, #tpu.memory_space<smem>>, %arg10: memref<1x1x128xf32, #tpu.memory_space<vmem>>) attributes {dimension_semantics = [#tpu.dimension_semantics<parallel>], iteration_bounds = array<i64: 1>, scalar_prefetch = 0 : i64, scratch_operands = 0 : i64, tpu.core_type = #tpu.core_type<tc>, window_params = [{transform_indices = @transform_0, window_bounds = array<i64: 128, 32>}, {pipeline_mode = #tpu.pipeline_mode<synchronous>, transform_indices = @transform_1, window_bounds = array<i64: 32, 512>}, {pipeline_mode = #tpu.pipeline_mode<synchronous>, transform_indices = @transform_2, window_bounds = array<i64: 1, 512>}, {pipeline_mode = #tpu.pipeline_mode<synchronous>, transform_indices = @transform_3, window_bounds = array<i64: 512, 256>}, {pipeline_mode = #tpu.pipeline_mode<synchronous>, transform_indices = @transform_4, window_bounds = array<i64: 1, 256>}, {pipeline_mode = #tpu.pipeline_mode<synchronous>, transform_indices = @transform_5, window_bounds = array<i64: 256, 128>}, {pipeline_mode = #tpu.pipeline_mode<synchronous>, transform_indices = @transform_6, window_bounds = array<i64: 1, 128>}, {pipeline_mode = #tpu.pipeline_mode<synchronous>, transform_indices = @transform_7, window_bounds = array<i64: 1, 128>}, {transform_indices = @transform_8, window_bounds = array<i64: 1, 1>}, {transform_indices = @transform_9, window_bounds = array<i64: 1, 1, 128>}]} {
    %c0 = arith.constant 0 : index
    %c0_0 = arith.constant 0 : index
    %0 = vector.load %arg1[%c0, %c0_0] : memref<128x32xf32, #tpu.memory_space<vmem>>, vector<128x32xf32>
    %1 = arith.truncf %0 : vector<128x32xf32> to vector<128x32xbf16>
    %c0_1 = arith.constant 0 : index
    %c0_2 = arith.constant 0 : index
    %2 = vector.load %arg2[%c0_1, %c0_2] : memref<32x512xbf16, #tpu.memory_space<vmem>>, vector<32x512xbf16>
    %cst = arith.constant dense<0.000000e+00> : vector<128x512xf32>
    %3 = tpu.matmul %1, %2, %cst {dimension_numbers = #tpu.dot_dimension_numbers<[1], [0], [0], [1], [0, 0, 1, 1], [], []>} : vector<128x32xbf16>, vector<32x512xbf16>, vector<128x512xf32> -> vector<128x512xf32>
    %c0_3 = arith.constant 0 : index
    %c0_4 = arith.constant 0 : index
    %4 = vector.load %arg3[%c0_3, %c0_4] : memref<1x512xf32, #tpu.memory_space<vmem>>, vector<1x512xf32>
    %5 = vector.broadcast %4 : vector<1x512xf32> to vector<128x512xf32>
    %6 = arith.addf %3, %5 : vector<128x512xf32>
    %cst_5 = arith.constant 0.000000e+00 : f32
    %7 = vector.broadcast %cst_5 : f32 to vector<128x512xf32>
    %8 = arith.maximumf %6, %7 : vector<128x512xf32>
    %9 = arith.truncf %8 : vector<128x512xf32> to vector<128x512xbf16>
    %c0_6 = arith.constant 0 : index
    %c0_7 = arith.constant 0 : index
    %10 = vector.load %arg4[%c0_6, %c0_7] : memref<512x256xbf16, #tpu.memory_space<vmem>>, vector<512x256xbf16>
    %cst_8 = arith.constant dense<0.000000e+00> : vector<128x256xf32>
    %11 = tpu.matmul %9, %10, %cst_8 {dimension_numbers = #tpu.dot_dimension_numbers<[1], [0], [0], [1], [0, 0, 1, 1], [], []>} : vector<128x512xbf16>, vector<512x256xbf16>, vector<128x256xf32> -> vector<128x256xf32>
    %c0_9 = arith.constant 0 : index
    %c0_10 = arith.constant 0 : index
    %12 = vector.load %arg5[%c0_9, %c0_10] : memref<1x256xf32, #tpu.memory_space<vmem>>, vector<1x256xf32>
    %13 = vector.broadcast %12 : vector<1x256xf32> to vector<128x256xf32>
    %14 = arith.addf %11, %13 : vector<128x256xf32>
    %cst_11 = arith.constant 0.000000e+00 : f32
    %15 = vector.broadcast %cst_11 : f32 to vector<128x256xf32>
    %16 = arith.maximumf %14, %15 : vector<128x256xf32>
    %17 = arith.truncf %16 : vector<128x256xf32> to vector<128x256xbf16>
    %c0_12 = arith.constant 0 : index
    %c0_13 = arith.constant 0 : index
    %18 = vector.load %arg6[%c0_12, %c0_13] : memref<256x128xbf16, #tpu.memory_space<vmem>>, vector<256x128xbf16>
    %cst_14 = arith.constant dense<0.000000e+00> : vector<128x128xf32>
    %19 = tpu.matmul %17, %18, %cst_14 {dimension_numbers = #tpu.dot_dimension_numbers<[1], [0], [0], [1], [0, 0, 1, 1], [], []>} : vector<128x256xbf16>, vector<256x128xbf16>, vector<128x128xf32> -> vector<128x128xf32>
    %c0_15 = arith.constant 0 : index
    %c0_16 = arith.constant 0 : index
    %20 = vector.load %arg7[%c0_15, %c0_16] : memref<1x128xf32, #tpu.memory_space<vmem>>, vector<1x128xf32>
    %21 = vector.broadcast %20 : vector<1x128xf32> to vector<128x128xf32>
    %22 = arith.addf %19, %21 : vector<128x128xf32>
    %cst_17 = arith.constant 0.000000e+00 : f32
    %23 = vector.broadcast %cst_17 : f32 to vector<128x128xf32>
    %24 = arith.maximumf %22, %23 : vector<128x128xf32>
    %c0_18 = arith.constant 0 : index
    %c0_19 = arith.constant 0 : index
    %25 = vector.load %arg8[%c0_18, %c0_19] : memref<1x128xf32, #tpu.memory_space<vmem>>, vector<1x128xf32>
    %26 = vector.broadcast %25 : vector<1x128xf32> to vector<128x128xf32>
    %27 = arith.mulf %24, %26 : vector<128x128xf32>
    %28 = vector.shape_cast %27 : vector<128x128xf32> to vector<1x128x128xf32>
    %cst_20 = arith.constant dense<0.000000e+00> : vector<1x128xf32>
    %29 = vector.multi_reduction <add>, %28, %cst_20 [2] : vector<1x128x128xf32> to vector<1x128xf32>
    %c0_21 = arith.constant 0 : index
    %c0_22 = arith.constant 0 : index
    %30 = memref.load %arg9[%c0_21, %c0_22] : memref<1x1xf32, #tpu.memory_space<smem>>
    %31 = vector.broadcast %30 : f32 to vector<1x128xf32>
    %32 = arith.addf %29, %31 : vector<1x128xf32>
    %33 = vector.shape_cast %32 : vector<1x128xf32> to vector<1x1x128xf32>
    %c0_23 = arith.constant 0 : index
    %c0_24 = arith.constant 0 : index
    %c0_25 = arith.constant 0 : index
    %34 = vector.load %arg10[%c0_23, %c0_24, %c0_25] : memref<1x1x128xf32, #tpu.memory_space<vmem>>, vector<1x1x128xf32>
    tpu.vector_store %arg10[%c0_23, %c0_24, %c0_25], %33 {strides = array<i32>} : memref<1x1x128xf32, #tpu.memory_space<vmem>>, vector<1x1x128xf32>,
    return
  }
  func.func @transform_0(%arg0: i32) -> (i32, i32) {
    %c0_i32 = arith.constant 0 : i32
    %c0_i32_0 = arith.constant 0 : i32
    return %arg0, %c0_i32 : i32, i32
  }
  func.func @transform_1(%arg0: i32) -> (i32, i32) {
    %c0_i32 = arith.constant 0 : i32
    %c0_i32_0 = arith.constant 0 : i32
    %c0_i32_1 = arith.constant 0 : i32
    return %c0_i32, %c0_i32_0 : i32, i32
  }
  func.func @transform_2(%arg0: i32) -> (i32, i32) {
    %c0_i32 = arith.constant 0 : i32
    %c0_i32_0 = arith.constant 0 : i32
    %c0_i32_1 = arith.constant 0 : i32
    return %c0_i32, %c0_i32_0 : i32, i32
  }
  func.func @transform_3(%arg0: i32) -> (i32, i32) {
    %c0_i32 = arith.constant 0 : i32
    %c0_i32_0 = arith.constant 0 : i32
    %c0_i32_1 = arith.constant 0 : i32
    return %c0_i32, %c0_i32_0 : i32, i32
  }
  func.func @transform_4(%arg0: i32) -> (i32, i32) {
    %c0_i32 = arith.constant 0 : i32
    %c0_i32_0 = arith.constant 0 : i32
    %c0_i32_1 = arith.constant 0 : i32
    return %c0_i32, %c0_i32_0 : i32, i32
  }
  func.func @transform_5(%arg0: i32) -> (i32, i32) {
    %c0_i32 = arith.constant 0 : i32
    %c0_i32_0 = arith.constant 0 : i32
    %c0_i32_1 = arith.constant 0 : i32
    return %c0_i32, %c0_i32_0 : i32, i32
  }
  func.func @transform_6(%arg0: i32) -> (i32, i32) {
    %c0_i32 = arith.constant 0 : i32
    %c0_i32_0 = arith.constant 0 : i32
    %c0_i32_1 = arith.constant 0 : i32
    return %c0_i32, %c0_i32_0 : i32, i32
  }
  func.func @transform_7(%arg0: i32) -> (i32, i32) {
    %c0_i32 = arith.constant 0 : i32
    %c0_i32_0 = arith.constant 0 : i32
    %c0_i32_1 = arith.constant 0 : i32
    return %c0_i32, %c0_i32_0 : i32, i32
  }
  func.func @transform_8(%arg0: i32) -> (i32, i32) {
    %c0_i32 = arith.constant 0 : i32
    %c0_i32_0 = arith.constant 0 : i32
    %c0_i32_1 = arith.constant 0 : i32
    return %c0_i32, %c0_i32_0 : i32, i32
  }
  func.func @transform_9(%arg0: i32) -> (i32, i32, i32) {
    %c0_i32 = arith.constant 0 : i32
    %c0_i32_0 = arith.constant 0 : i32
    %c0_i32_1 = arith.constant 0 : i32
    return %arg0, %c0_i32, %c0_i32_0 : i32, i32, i32
  }
}

</mosaic_0001>

<bundles_post_ra>
// kernel: tpu_custom_call.1
= control target key start
LH: loop header
LB: loop body
LE: loop exit
PB: predicated region body
PF: predicated region fallthrough
CT: control target
= control target key end

     0   :  { %15 = vsyncpa [#allocation4], 0  ;;  %s2739_s0 = inlined_call_operand.vmem [shape: f32[128,32], index: 0, kind: input, shape index: {}]   ;;  %s2740_s1 = inlined_call_operand.hbm [shape: bf16[32,512], index: 1, kind: input, shape index: {}]   ;;  %s2741_s2 = inlined_call_operand.vmem [shape: f32[1,512], index: 2, kind: input, shape index: {}]   ;;  %s2742_s3 = inlined_call_operand.hbm [shape: bf16[512,256], index: 3, kind: input, shape index: {}]   ;;  %s2743_s4 = inlined_call_operand.vmem [shape: f32[1,256], index: 4, kind: input, shape index: {}]   ;;  %s2744_s5 = inlined_call_operand.vmem [shape: bf16[256,128], index: 5, kind: input, shape index: {}]   ;;  %s2745_s6 = inlined_call_operand.vmem [shape: f32[1,128], index: 6, kind: input, shape index: {}]   ;;  %s2746_s7 = inlined_call_operand.vmem [shape: f32[1,128], index: 7, kind: input, shape index: {}]   ;;  %s2747_s8 = inlined_call_operand.<no memory space> [shape: f32[1,1], index: 8, kind: input, shape index: {}]   ;;  %s2748_s9 = inlined_call_operand.hbm [shape: f32[1,1,128], index: 9, kind: output, shape index: {}]  }
   0x1   :  { %16 = vsyncpa [#allocation7], 0 }
   0x2   :  { %17 = vsyncpa [#allocation5], 0  ;;  %s2110_s30 = smov [#allocation3]   ;;  %s2038_s13 = scalar_lea.hbm %s2740_s1, 1024 }
   0x3   :  { %s25_s10 = sshll.u32 %s2110_s30, 4  ;;  %p2039_p0 = scmp.ne.s32.totalorder %s2740_s1, %s2038_s13  ;;  %s26_s10 = int_to_ptr.vmem [resolvable:$true] %s25_s10 }
   0x4   :  { %p2042_p1 = scmp.lt.u32.totalorder %s2038_s13, %s2740_s1 }
   0x6   :  { %p2044_p2 = pnand %p2042_p1, %p2039_p0 }
   0x8   :  { %2047 = shalt.err (!%p2044_p2)
}
   0x9   :  { %s2048_s18 = scalar_lea.vmem %s26_s10, 1024  ;;  %p2053_p4 = scmp.lt.s32.totalorder %s26_s10, %s26_s10 }
   0xa   :  { %p2049_p3 = scmp.ne.s32.totalorder %s26_s10, %s2048_s18  ;;  %p2054_p5 = scmp.lt.s32.totalorder %s2048_s18, %s2048_s18 }
   0xc   :  { %p2055_p6 = por %p2054_p5, %p2053_p4 }
   0xe   :  { %p2056_p7 = pnand %p2055_p6, %p2049_p3 }
  0x10   :  { %2059 = shalt.err (!%p2056_p7)
}
  0x11   :  { %s2111_s19 = smov 256   ;;  %s2112_s20 = smov 16  }
  0x12   :  { %31 = dma.hbm_to_vmem [thread:$0]  %s2740_s1, 1024, %s26_s10, [#allocation4], %s2111_s19, %s2111_s19, %s2112_s20  }
  0x13   :  { %s2113_s23 = smov [#allocation6]   ;;  %s2060_s27 = scalar_lea.hbm %s2742_s3, 8192 }
  0x14   :  { %s39_s24 = sshll.u32 %s2113_s23, 4  ;;  %p2061_p8 = scmp.ne.s32.totalorder %s2742_s3, %s2060_s27  ;;  %s40_s24 = int_to_ptr.vmem [resolvable:$true] %s39_s24 }
  0x15   :  { %p2064_p9 = scmp.lt.u32.totalorder %s2060_s27, %s2742_s3 }
  0x17   :  { %p2066_p10 = pnand %p2064_p9, %p2061_p8 }
  0x19   :  { %2069 = shalt.err (!%p2066_p10)
}
  0x1a   :  { %s2070_s12 = scalar_lea.vmem %s40_s24, 8192  ;;  %p2075_p12 = scmp.lt.s32.totalorder %s40_s24, %s40_s24 }
  0x1b   :  { %p2071_p11 = scmp.ne.s32.totalorder %s40_s24, %s2070_s12  ;;  %p2076_p13 = scmp.lt.s32.totalorder %s2070_s12, %s2070_s12 }
  0x1d   :  { %p2077_p0 = por %p2076_p13, %p2075_p12 }
  0x1f   :  { %p2078_p1 = pnand %p2077_p0, %p2071_p11 }
  0x21   :  { %2081 = shalt.err (!%p2078_p1)
}
  0x22   :  { %s2114_s1 = smov 128   ;;  %s2115_s10 = smov 8  }
  0x23   :  { %45 = dma.hbm_to_vmem [thread:$0]  %s2742_s3, 8192, %s40_s24, [#allocation7], %s2114_s1, %s2114_s1, %s2115_s10  }
  0x24   :  { %2104 = dma.done.wait [#allocation4], 1024  }
  0x25   :  { %2105 = vsyncadd [#allocation4], 4294966272 }
  0x26   :  { %2106 = dma.done.wait [#allocation7], 8192  }
  0x27   :  { %2107 = vsyncadd [#allocation7], 4294959104  ;;  %v2116_v0 = vmov 0   ;;  %v1914_v1 = vld [vmem:[#allocation3 + $0x4] ss:$16 sps:$4 sm:$0xff]   ;;  %v64_v10 = vld [vmem:[%s2739_s0 + $0x8] sm:$0xff] }
  0x28   :  { %214 = vmatprep.mubr.bf16.mxu0 %v2116_v0  ;;  %327 = vmatprep.mubr.bf16.mxu1 %v2116_v0  ;;  %v1916_v2 = vld [vmem:[#allocation3] ss:$16 sps:$4 sm:$0xff]   ;;  %v1917_v3 = vld [vmem:[#allocation3 + $0xc] ss:$16 sps:$4 sm:$0xff]   ;;  %v1919_v4 = vld [vmem:[#allocation3 + $0x8] ss:$16 sps:$4 sm:$0xff]  }
  0x29   :  { %182 = vmatprep.subr.bf16.mxu0 %v1914_v1  ;;  %v1920_v5 = vld [vmem:[#allocation3 + $0x24] ss:$16 sps:$4 sm:$0xff]   ;;  %v1922_v6 = vld [vmem:[#allocation3 + $0x20] ss:$16 sps:$4 sm:$0xff]   ;;  %295 = vmatprep.subr.bf16.mxu1 %v1917_v3  ;;  %v1923_v7 = vld [vmem:[#allocation3 + $0x2c] ss:$16 sps:$4 sm:$0xff]  }
  0x2a   :  { %183 = vmatpush1.bf16.msra.mxu0 %v1916_v2  ;;  %296 = vmatpush1.bf16.msra.mxu1 %v1919_v4  ;;  %v1925_v8 = vld [vmem:[#allocation3 + $0x28] ss:$16 sps:$4 sm:$0xff]   ;;  %v63_v9 = vld [vmem:[%s2739_s0] sm:$0xff]  ;;  %vm157_vm0 = vcmask 261120   ;;  %v65_v12 = vld [vmem:[%s2739_s0 + $0x10] sm:$0xff]  ;;  %vm1522_vm1 = vcmask 130112  }
  0x2b   :  { %184 = vmatprep.subr.bf16.mxu0 %v1920_v5  ;;  %297 = vmatprep.subr.bf16.mxu1 %v1923_v7  ;;  %v79_v11 = vpack.c.bf16 %v64_v10, %v63_v9  ;;  %v66_v13 = vld [vmem:[%s2739_s0 + $0x18] sm:$0xff]  ;;  %v1926_v14 = vld [vmem:[#allocation6] ss:$8 sps:$4 sm:$0xff]   ;;  %v1928_v15 = vld [vmem:[#allocation6 + $0x4] ss:$8 sps:$4 sm:$0xff]   ;;  %vm1529_vm2 = vcmask 195712  }
  0x2c   :  { %v1931_v16 = vld [vmem:[#allocation6 + $0x14] ss:$8 sps:$4 sm:$0xff]   ;;  %v80_v17 = vpack.c.bf16 %v66_v13, %v65_v12  ;;  %v1929_v18 = vld [vmem:[#allocation6 + $0x10] ss:$8 sps:$4 sm:$0xff]   ;;  %v1934_v19 = vld [vmem:[#allocation6 + $0x24] ss:$8 sps:$4 sm:$0xff]  }
  0x2d   :  { %v67_v20 = vld [vmem:[%s2739_s0 + $0x20] sm:$0xff]  ;;  %v68_v21 = vld [vmem:[%s2739_s0 + $0x28] sm:$0xff]  ;;  %v1937_v23 = vld [vmem:[#allocation6 + $0x34] ss:$8 sps:$4 sm:$0xff]   ;;  %vm1536_vm3 = vcmask 261312   ;;  %vm1543_vm4 = vcmask 326912  }
  0x2e   :  { %185 = vmatpush1.bf16.msra.mxu0 %v1922_v6  ;;  %298 = vmatpush1.bf16.msra.mxu1 %v1925_v8  ;;  %v1932_v22 = vld [vmem:[#allocation6 + $0x20] ss:$8 sps:$4 sm:$0xff]   ;;  %v81_v24 = vpack.c.bf16 %v68_v21, %v67_v20  ;;  %v1935_v25 = vld [vmem:[#allocation6 + $0x30] ss:$8 sps:$4 sm:$0xff]   ;;  %v2222_v27 = vld [vmem:[#allocation6 + $0x104] ss:$8 sps:$4 sm:$0xff]  }
  0x2f   :  { %900 = vmatprep.subr.bf16.mxu0 %v1928_v15  ;;  %v2220_v26 = vld [vmem:[#allocation6 + $0x100] ss:$8 sps:$4 sm:$0xff]   ;;  %v1940_v28 = vld [vmem:[#allocation6 + $0x44] ss:$8 sps:$4 sm:$0xff]   ;;  %v69_v29 = vld [vmem:[%s2739_s0 + $0x30] sm:$0xff]  ;;  %1810 = vmatprep.subr.bf16.mxu1 %v2222_v27  ;;  %vm1550_vm5 = vcmask 392512  }
  0x30   :  { %v2230_v30 = vld [vmem:[#allocation6 + $0x110] ss:$8 sps:$4 sm:$0xff]   ;;  %v2232_v31 = vld [vmem:[#allocation6 + $0x114] ss:$8 sps:$4 sm:$0xff]   ;;  %v1938_v33 = vld [vmem:[#allocation6 + $0x40] ss:$8 sps:$4 sm:$0xff]  }
  0x31   :  { %1648 = vmatmul.mubr.msk.bf16.vlgmr.msra.gmra.mrb[0].mxu0 %vm157_vm0, %v79_v11  ;;  %1656 = vmatmul.mubr.msk.bf16.vlgmr.msra.gmra.mrb[0].mxu1 %vm157_vm0, %v79_v11  ;;  %v70_v32 = vld [vmem:[%s2739_s0 + $0x38] sm:$0xff]  ;;  %v2241_v35 = vld [vmem:[#allocation6 + $0x124] ss:$8 sps:$4 sm:$0xff]   ;;  %v2244_v37 = vld [vmem:[#allocation6 + $0x120] ss:$8 sps:$4 sm:$0xff]   ;;  %vm1557_vm6 = vcmask 458112  }
  0x32   :  { %224 = vmatprep.mubr.bf16.mxu0 %v2116_v0  ;;  %337 = vmatprep.mubr.bf16.mxu1 %v2116_v0  ;;  %v1943_v34 = vld [vmem:[#allocation6 + $0x54] ss:$8 sps:$4 sm:$0xff]   ;;  %v82_v36 = vpack.c.bf16 %v70_v32, %v69_v29  ;;  %v1941_v38 = vld [vmem:[#allocation6 + $0x50] ss:$8 sps:$4 sm:$0xff]   ;;  %v1946_v39 = vld [vmem:[#allocation6 + $0x64] ss:$8 sps:$4 sm:$0xff]  }
  0x33   :  { %901 = vmatpush1.bf16.msra.mxu0 %v1926_v14  ;;  %1826 = vmatpush1.bf16.msra.mxu1 %v2220_v26  ;;  %v71_v40 = vld [vmem:[%s2739_s0 + $0x40] sm:$0xff]  ;;  %v72_v41 = vld [vmem:[%s2739_s0 + $0x48] sm:$0xff]  ;;  %v2253_v42 = vld [vmem:[#allocation6 + $0x134] ss:$8 sps:$4 sm:$0xff]   ;;  %vm1564_vm7 = vcmask 523712   ;;  %vm1571_vm8 = vcmask 589312  }
  0x34   :  { %902 = vmatprep.subr.bf16.mxu0 %v1931_v16  ;;  %1811 = vmatprep.subr.bf16.mxu1 %v2232_v31  ;;  %v1944_v43 = vld [vmem:[#allocation6 + $0x60] ss:$8 sps:$4 sm:$0xff]   ;;  %v2257_v44 = vld [vmem:[#allocation6 + $0x130] ss:$8 sps:$4 sm:$0xff]   ;;  %v1949_v45 = vld [vmem:[#allocation6 + $0x74] ss:$8 sps:$4 sm:$0xff]   ;;  %v83_v49 = vpack.c.bf16 %v72_v41, %v71_v40 }
  0x35   :  { %v2260_v46 = vld [vmem:[#allocation6 + $0x144] ss:$8 sps:$4 sm:$0xff]   ;;  %v2263_v47 = vld [vmem:[#allocation6 + $0x140] ss:$8 sps:$4 sm:$0xff]   ;;  %v1947_v48 = vld [vmem:[#allocation6 + $0x70] ss:$8 sps:$4 sm:$0xff]  }
  0x36   :  { %v1952_v50 = vld [vmem:[#allocation6 + $0x84] ss:$8 sps:$4 sm:$0xff]   ;;  %v73_v51 = vld [vmem:[%s2739_s0 + $0x50] sm:$0xff]  ;;  %v74_v52 = vld [vmem:[%s2739_s0 + $0x58] sm:$0xff]  ;;  %vm1578_vm9 = vcmask 654912   ;;  %vm1585_vm10 = vcmask 720512  }
  0x37   :  { %903 = vmatpush1.bf16.msra.mxu0 %v1929_v18  ;;  %1827 = vmatpush1.bf16.msra.mxu1 %v2230_v30  ;;  %v1950_v53 = vld [vmem:[#allocation6 + $0x80] ss:$8 sps:$4 sm:$0xff]   ;;  %v1958_v54 = vld [vmem:[#allocation6 + $0x94] ss:$8 sps:$4 sm:$0xff]   ;;  %v1956_v55 = vld [vmem:[#allocation6 + $0x90] ss:$8 sps:$4 sm:$0xff]   ;;  %v84_v56 = vpack.c.bf16 %v74_v52, %v73_v51 }
  0x38   :  { %904 = vmatprep.subr.bf16.mxu0 %v1934_v19  ;;  %1812 = vmatprep.subr.bf16.mxu1 %v2241_v35  ;;  %v1964_v57 = vld [vmem:[#allocation6 + $0xa4] ss:$8 sps:$4 sm:$0xff]   ;;  %v1962_v60 = vld [vmem:[#allocation6 + $0xa0] ss:$8 sps:$4 sm:$0xff]   ;;  %v1970_v61 = vld [vmem:[#allocation6 + $0xb4] ss:$8 sps:$4 sm:$0xff]  }
  0x39   :  { %1649 = vmatmul.mubr.msk.bf16.gmra.mrb[4].mxu0 %vm157_vm0, %v80_v17  ;;  %1657 = vmatmul.mubr.msk.bf16.gmra.mrb[4].mxu1 %vm157_vm0, %v80_v17  ;;  %v75_v58 = vld [vmem:[%s2739_s0 + $0x60] sm:$0xff]  ;;  %v76_v59 = vld [vmem:[%s2739_s0 + $0x68] sm:$0xff]  ;;  %v1968_v63 = vld [vmem:[#allocation6 + $0xb0] ss:$8 sps:$4 sm:$0xff]   ;;  %vm1592_vm11 = vcmask 786112   ;;  %vm1599_vm12 = vcmask 851712  }
  0x3a   :  { %234 = vmatprep.mubr.bf16.mxu0 %v2116_v0  ;;  %347 = vmatprep.mubr.bf16.mxu1 %v2116_v0  ;;  %v85_v62 = vpack.c.bf16 %v76_v59, %v75_v58  ;;  %v1976_v1 = vld [vmem:[#allocation6 + $0xc4] ss:$8 sps:$4 sm:$0xff]   ;;  %v77_v2 = vld [vmem:[%s2739_s0 + $0x70] sm:$0xff]  ;;  %v78_v3 = vld [vmem:[%s2739_s0 + $0x78] sm:$0xff]  ;;  %vm1606_vm13 = vcmask 917312   ;;  %vm1613_vm14 = vcmask 982912  }
  0x3b   :  { %905 = vmatpush1.bf16.msra.mxu0 %v1932_v22  ;;  %1828 = vmatpush1.bf16.msra.mxu1 %v2244_v37  ;;  %v1974_v4 = vld [vmem:[#allocation6 + $0xc0] ss:$8 sps:$4 sm:$0xff]   ;;  %v1982_v5 = vld [vmem:[#allocation6 + $0xd4] ss:$8 sps:$4 sm:$0xff]   ;;  %v86_v6 = vpack.c.bf16 %v78_v3, %v77_v2  ;;  %v1980_v7 = vld [vmem:[#allocation6 + $0xd0] ss:$8 sps:$4 sm:$0xff]  }
  0x3c   :  { %906 = vmatprep.subr.bf16.mxu0 %v1937_v23  ;;  %1813 = vmatprep.subr.bf16.mxu1 %v2253_v42  ;;  %v2302_v8 = vld [vmem:[#allocation6 + $0x154] ss:$8 sps:$4 sm:$0xff]   ;;  %v2304_v9 = vld [vmem:[#allocation6 + $0x150] ss:$8 sps:$4 sm:$0xff]   ;;  %v1988_v10 = vld [vmem:[#allocation6 + $0xe4] ss:$8 sps:$4 sm:$0xff]  }
  0x3d   :  { %v1986_v11 = vld [vmem:[#allocation6 + $0xe0] ss:$8 sps:$4 sm:$0xff]   ;;  %v1994_v13 = vld [vmem:[#allocation6 + $0xf4] ss:$8 sps:$4 sm:$0xff]   ;;  %v1992_v14 = vld [vmem:[#allocation6 + $0xf0] ss:$8 sps:$4 sm:$0xff]  }
  0x3e   :  { %v2310_v12 = vld [vmem:[#allocation6 + $0x160] ss:$8 sps:$4 sm:$0xff]   ;;  %v2314_v15 = vld [vmem:[#allocation6 + $0x174] ss:$8 sps:$4 sm:$0xff]   ;;  %v2316_v16 = vld [vmem:[#allocation6 + $0x170] ss:$8 sps:$4 sm:$0xff]  }
  0x3f   :  { %907 = vmatpush1.bf16.msra.mxu0 %v1935_v25  ;;  %1829 = vmatpush1.bf16.msra.mxu1 %v2257_v44  ;;  %v2321_v17 = vld [vmem:[#allocation6 + $0x184] ss:$8 sps:$4 sm:$0xff]   ;;  %v2323_v18 = vld [vmem:[#allocation6 + $0x180] ss:$8 sps:$4 sm:$0xff]   ;;  %v2327_v19 = vld [vmem:[#allocation6 + $0x194] ss:$8 sps:$4 sm:$0xff]  }
  0x40   :  { %908 = vmatprep.subr.bf16.mxu0 %v1940_v28  ;;  %1814 = vmatprep.subr.bf16.mxu1 %v2260_v46  ;;  %v2329_v20 = vld [vmem:[#allocation6 + $0x190] ss:$8 sps:$4 sm:$0xff]   ;;  %v2333_v21 = vld [vmem:[#allocation6 + $0x1a4] ss:$8 sps:$4 sm:$0xff]   ;;  %v2335_v22 = vld [vmem:[#allocation6 + $0x1a0] ss:$8 sps:$4 sm:$0xff]  }
  0x41   :  { %1650 = vmatmul.mubr.msk.bf16.gmra.mrb[8].mxu0 %vm157_vm0, %v81_v24  ;;  %1658 = vmatmul.mubr.msk.bf16.gmra.mrb[8].mxu1 %vm157_vm0, %v81_v24  ;;  %v2339_v23 = vld [vmem:[#allocation6 + $0x1b4] ss:$8 sps:$4 sm:$0xff]   ;;  %v2341_v24 = vld [vmem:[#allocation6 + $0x1b0] ss:$8 sps:$4 sm:$0xff]   ;;  %v2345_v25 = vld [vmem:[#allocation6 + $0x1c4] ss:$8 sps:$4 sm:$0xff]  }
  0x42   :  { %244 = vmatprep.mubr.bf16.mxu0 %v2116_v0  ;;  %357 = vmatprep.mubr.bf16.mxu1 %v2116_v0  ;;  %v2351_v28 = vld [vmem:[#allocation6 + $0x1d4] ss:$8 sps:$4 sm:$0xff]   ;;  %v2353_v29 = vld [vmem:[#allocation6 + $0x1d0] ss:$8 sps:$4 sm:$0xff]   ;;  %v2357_v32 = vld [vmem:[#allocation6 + $0x1e4] ss:$8 sps:$4 sm:$0xff]  }
  0x43   :  { %909 = vmatpush1.bf16.msra.mxu0 %v1938_v33  ;;  %1830 = vmatpush1.bf16.msra.mxu1 %v2263_v47  ;;  %v2359_v33 = vld [vmem:[#allocation6 + $0x1e0] ss:$8 sps:$4 sm:$0xff]   ;;  %vm1620_vm15 = vcmask 1048512  }
  0x44   :  { %910 = vmatprep.subr.bf16.mxu0 %v1943_v34  ;;  %1815 = vmatprep.subr.bf16.mxu1 %v2302_v8  ;;  %v2363_v34 = vld [vmem:[#allocation6 + $0x1f4] ss:$8 sps:$4 sm:$0xff]   ;;  %v95_v41 = vld [vmem:[%s2741_s2] sm:$0xf] }
  0x47   :  { %911 = vmatpush1.bf16.msra.mxu0 %v1941_v38  ;;  %1831 = vmatpush1.bf16.msra.mxu1 %v2304_v9  ;;  %v97_v38 = vlaneseq }
  0x48   :  { %912 = vmatprep.subr.bf16.mxu0 %v1946_v39 }
  0x49   :  { %1651 = vmatmul.mubr.msk.bf16.gmra.mrb[12].mxu0 %vm157_vm0, %v82_v36  ;;  %1659 = vmatmul.mubr.msk.bf16.gmra.mrb[12].mxu1 %vm157_vm0, %v82_v36  ;;  %v2365_v36 = vld [vmem:[#allocation6 + $0x1f0] ss:$8 sps:$4 sm:$0xff]   ;;  %v2370_v39 = vshrl.u32 %v97_v38, 7 }
  0x4a   :  { %254 = vmatprep.mubr.bf16.mxu0 %v2116_v0  ;;  %367 = vmatprep.mubr.bf16.mxu1 %v2116_v0 }
  0x4b   :  { %913 = vmatpush1.bf16.msra.mxu0 %v1944_v43  ;;  %v99_v40 = vsub.s32 0, %v2370_v39  ;;  %v103_v43 = vsub.s32 1, %v2370_v39 }
  0x4c   :  { %914 = vmatprep.subr.bf16.mxu0 %v1949_v45 }
  0x4d   :  { %v2379_v45 = vrot.slane %v95_v41, %v99_v40 }
  0x4f   :  { %915 = vmatpush1.bf16.msra.mxu0 %v1947_v48  ;;  %v107_v48 = vsub.s32 2, %v2370_v39 }
  0x50   :  { %916 = vmatprep.subr.bf16.mxu0 %v1952_v50  ;;  %v111_v50 = vsub.s32 3, %v2370_v39 }
  0x51   :  { %1652 = vmatmul.mubr.msk.bf16.gmra.mrb[16].mxu0 %vm157_vm0, %v83_v49  ;;  %1660 = vmatmul.mubr.msk.bf16.gmra.mrb[16].mxu1 %vm157_vm0, %v83_v49  ;;  %v2384_v49 = vrot.slane %v95_v41, %v103_v43 }
  0x52   :  { %264 = vmatprep.mubr.bf16.mxu0 %v2116_v0  ;;  %377 = vmatprep.mubr.bf16.mxu1 %v2116_v0  ;;  %v2391_v58 = vrot.slane %v95_v41, %v111_v50 }
  0x53   :  { %917 = vmatpush1.bf16.msra.mxu0 %v1950_v53 }
  0x54   :  { %918 = vmatprep.subr.bf16.mxu0 %v1958_v54  ;;  %v2388_v54 = vrot.slane %v95_v41, %v107_v48 }
  0x57   :  { %919 = vmatpush1.bf16.msra.mxu0 %v1956_v55 }
  0x58   :  { %920 = vmatprep.subr.bf16.mxu0 %v1964_v57 }
  0x59   :  { %1653 = vmatmul.mubr.msk.bf16.gmra.mrb[20].mxu0 %vm157_vm0, %v84_v56  ;;  %1661 = vmatmul.mubr.msk.bf16.gmra.mrb[20].mxu1 %vm157_vm0, %v84_v56 }
  0x5a   :  { %274 = vmatprep.mubr.bf16.mxu0 %v2116_v0  ;;  %387 = vmatprep.mubr.bf16.mxu1 %v2116_v0 }
  0x5b   :  { %921 = vmatpush1.bf16.msra.mxu0 %v1962_v60 }
  0x5c   :  { %922 = vmatprep.subr.bf16.mxu0 %v1970_v61 }
  0x5f   :  { %923 = vmatpush1.bf16.msra.mxu0 %v1968_v63 }
  0x60   :  { %924 = vmatprep.subr.bf16.mxu0 %v1976_v1 }
  0x61   :  { %1654 = vmatmul.mubr.msk.bf16.gmra.mrb[24].mxu0 %vm157_vm0, %v85_v62  ;;  %1662 = vmatmul.mubr.msk.bf16.gmra.mrb[24].mxu1 %vm157_vm0, %v85_v62 }
  0x62   :  { %284 = vmatprep.mubr.bf16.mxu0 %v2116_v0  ;;  %397 = vmatprep.mubr.bf16.mxu1 %v2116_v0  ;;  %v2308_v0 = vld [vmem:[#allocation6 + $0x164] ss:$8 sps:$4 sm:$0xff]  }
  0x63   :  { %925 = vmatpush1.bf16.msra.mxu0 %v1974_v4  ;;  %1816 = vmatprep.subr.bf16.mxu1 %v2308_v0 }
  0x64   :  { %926 = vmatprep.subr.bf16.mxu0 %v1982_v5  ;;  %1832 = vmatpush1.bf16.msra.mxu1 %v2310_v12 }
  0x65   :  { %1817 = vmatprep.subr.bf16.mxu1 %v2314_v15 }
  0x67   :  { %927 = vmatpush1.bf16.msra.mxu0 %v1980_v7 }
  0x68   :  { %928 = vmatprep.subr.bf16.mxu0 %v1988_v10  ;;  %1833 = vmatpush1.bf16.msra.mxu1 %v2316_v16 }
  0x69   :  { %1655 = vmatmul.mubr.msk.bf16.gmra.mrb[28].mxu0 %vm157_vm0, %v86_v6  ;;  %1663 = vmatmul.mubr.msk.bf16.gmra.mrb[28].mxu1 %vm157_vm0, %v86_v6 }
  0x6a   :  { %1818 = vmatprep.subr.bf16.mxu1 %v2321_v17 }
  0x6b   :  { %929 = vmatpush1.bf16.msra.mxu0 %v1986_v11 }
  0x6c   :  { %930 = vmatprep.subr.bf16.mxu0 %v1994_v13  ;;  %1834 = vmatpush1.bf16.msra.mxu1 %v2323_v18 }
  0x6d   :  { %1819 = vmatprep.subr.bf16.mxu1 %v2327_v19 }
  0x6f   :  { %931 = vmatpush1.bf16.msra.mxu0 %v1992_v14 }
  0x70   :  { %1013 = vmatprep.subr.bf16.mxu0 %v2222_v27  ;;  %1835 = vmatpush1.bf16.msra.mxu1 %v2329_v20  ;;  %v2347_v27 = vld [vmem:[#allocation6 + $0x1c0] ss:$8 sps:$4 sm:$0xff]  }
  0x71   :  { %1820 = vmatprep.subr.bf16.mxu1 %v2333_v21 }
  0x74   :  { %1836 = vmatpush1.bf16.msra.mxu1 %v2335_v22 }
  0x75   :  { %1821 = vmatprep.subr.bf16.mxu1 %v2339_v23 }
  0x78   :  { %1837 = vmatpush1.bf16.msra.mxu1 %v2341_v24 }
  0x79   :  { %1822 = vmatprep.subr.bf16.mxu1 %v2345_v25 }
  0x7c   :  { %1838 = vmatpush1.bf16.msra.mxu1 %v2347_v27 }
  0x7d   :  { %1823 = vmatprep.subr.bf16.mxu1 %v2351_v28 }
  0x80   :  { %1839 = vmatpush1.bf16.msra.mxu1 %v2353_v29 }
  0x81   :  { %1824 = vmatprep.subr.bf16.mxu1 %v2357_v32 }
  0x84   :  { %1840 = vmatpush1.bf16.msra.mxu1 %v2359_v33 }
  0x85   :  { %1825 = vmatprep.subr.bf16.mxu1 %v2363_v34 }
  0x88   :  { %1841 = vmatpush1.bf16.msra.mxu1 %v2365_v36 }
 0x104   :  { %v216_v51 = vpop.f32.mrb[0].mxu0  ;;  %v329_v57 = vpop.f32.mrb[0].mxu1 }
 0x105   :  { %v217_v52 = vadd.f32 %v216_v51, %v2379_v45  ;;  %v218_v53 = vpop.f32.mrb[1].mxu0  ;;  %v330_v61 = vadd.f32 %v329_v57, %v2388_v54  ;;  %v331_v62 = vpop.f32.mrb[1].mxu1 }
 0x106   :  { %v219_v55 = vadd.f32 %v218_v53, %v2384_v49  ;;  %v220_v56 = vpop.f32.mrb[2].mxu0  ;;  %v332_v1 = vadd.f32 %v331_v62, %v2391_v58  ;;  %v333_v2 = vpop.f32.mrb[2].mxu1 }
 0x107   :  { %v221_v59 = vadd.f32 %v220_v56, %v2379_v45  ;;  %v222_v60 = vpop.f32.mrb[3].mxu0  ;;  %v408_v3 = vmax.f32 %v217_v52, 0.0  ;;  %v410_v5 = vmax.f32 %v330_v61, 0.0  ;;  %v334_v6 = vadd.f32 %v333_v2, %v2388_v54  ;;  %v335_v7 = vpop.f32.mrb[3].mxu1 }
 0x108   :  { %v223_v63 = vadd.f32 %v222_v60, %v2384_v49  ;;  %v409_v10 = vmax.f32 %v219_v55, 0.0  ;;  %v411_v13 = vmax.f32 %v332_v1, 0.0  ;;  %v336_v14 = vadd.f32 %v335_v7, %v2391_v58 }
 0x109   :  { %v412_v4 = vmax.f32 %v221_v59, 0.0  ;;  %v414_v48 = vmax.f32 %v334_v6, 0.0 }
 0x10a   :  { %v413_v11 = vmax.f32 %v223_v63, 0.0  ;;  %v415_v53 = vmax.f32 %v336_v14, 0.0 }
 0x10b   :  { %v472_v41 = vpack.c.bf16 %v412_v4, %v408_v3  ;;  %v2400_v60 = vpack.c.bf16 %v414_v48, %v410_v5 }
 0x10c   :  { %v473_v50 = vpack.c.bf16 %v413_v11, %v409_v10  ;;  %v226_v51 = vpop.f32.mrb[4].mxu0  ;;  %v2403_v61 = vpack.c.bf16 %v415_v53, %v411_v13  ;;  %v339_v55 = vpop.f32.mrb[4].mxu1 }
 0x10d   :  { %v227_v56 = vadd.f32 %v226_v51, %v2379_v45  ;;  %v228_v57 = vpop.f32.mrb[5].mxu0  ;;  %v340_v1 = vadd.f32 %v339_v55, %v2388_v54  ;;  %v341_v2 = vpop.f32.mrb[5].mxu1 }
 0x10e   :  { %v229_v52 = vadd.f32 %v228_v57, %v2384_v49  ;;  %v230_v59 = vpop.f32.mrb[6].mxu0  ;;  %932 = vmatprep.mubr.bf16.mxu0 %v473_v50  ;;  %v342_v4 = vadd.f32 %v341_v2, %v2391_v58  ;;  %v343_v5 = vpop.f32.mrb[6].mxu1 }
 0x10f   :  { %v231_v62 = vadd.f32 %v230_v59, %v2379_v45  ;;  %v232_v63 = vpop.f32.mrb[7].mxu0  ;;  %933 = vmatmul.mubr.bf16.vlgmr.msra.gmra.mrb[32].mxu0 %v472_v41  ;;  %v416_v6 = vmax.f32 %v227_v56, 0.0  ;;  %v418_v10 = vmax.f32 %v340_v1, 0.0  ;;  %v344_v11 = vadd.f32 %v343_v5, %v2388_v54  ;;  %v345_v13 = vpop.f32.mrb[7].mxu1 }
 0x110   :  { %v233_v3 = vadd.f32 %v232_v63, %v2384_v49  ;;  %1014 = vmatpush1.bf16.msra.mxu0 %v2220_v26  ;;  %v417_v14 = vmax.f32 %v229_v52, 0.0  ;;  %v419_v48 = vmax.f32 %v342_v4, 0.0  ;;  %v346_v50 = vadd.f32 %v345_v13, %v2391_v58 }
 0x111   :  { %v420_v7 = vmax.f32 %v231_v62, 0.0  ;;  %1015 = vmatprep.subr.bf16.mxu0 %v2232_v31  ;;  %v422_v53 = vmax.f32 %v344_v11, 0.0 }
 0x112   :  { %v421_v41 = vmax.f32 %v233_v3, 0.0  ;;  %v423_v59 = vmax.f32 %v346_v50, 0.0 }
 0x113   :  { %v476_v51 = vpack.c.bf16 %v420_v7, %v416_v6  ;;  %v2416_v31 = vpack.c.bf16 %v422_v53, %v418_v10 }
 0x114   :  { %v477_v57 = vpack.c.bf16 %v421_v41, %v417_v14  ;;  %1016 = vmatpush1.bf16.msra.mxu0 %v2230_v30  ;;  %v236_v26 = vpop.f32.mrb[8].mxu0  ;;  %v2419_v63 = vpack.c.bf16 %v423_v59, %v419_v48  ;;  %v349_v1 = vpop.f32.mrb[8].mxu1 }
 0x115   :  { %v237_v56 = vadd.f32 %v236_v26, %v2379_v45  ;;  %v238_v55 = vpop.f32.mrb[9].mxu0  ;;  %1017 = vmatprep.subr.bf16.mxu0 %v2241_v35  ;;  %v350_v30 = vadd.f32 %v349_v1, %v2388_v54  ;;  %v351_v4 = vpop.f32.mrb[9].mxu1 }
 0x116   :  { %v239_v52 = vadd.f32 %v238_v55, %v2384_v49  ;;  %v240_v62 = vpop.f32.mrb[10].mxu0  ;;  %942 = vmatprep.mubr.bf16.mxu0 %v477_v57  ;;  %v352_v35 = vadd.f32 %v351_v4, %v2391_v58  ;;  %v353_v6 = vpop.f32.mrb[10].mxu1 }
 0x117   :  { %v241_v2 = vadd.f32 %v240_v62, %v2379_v45  ;;  %v242_v3 = vpop.f32.mrb[11].mxu0  ;;  %943 = vmatmul.mubr.bf16.gmra.mrb[36].mxu0 %v476_v51  ;;  %v424_v7 = vmax.f32 %v237_v56, 0.0  ;;  %v426_v11 = vmax.f32 %v350_v30, 0.0  ;;  %v354_v13 = vadd.f32 %v353_v6, %v2388_v54  ;;  %v355_v14 = vpop.f32.mrb[11].mxu1 }
 0x118   :  { %v243_v5 = vadd.f32 %v242_v3, %v2384_v49  ;;  %1018 = vmatpush1.bf16.msra.mxu0 %v2244_v37  ;;  %v425_v41 = vmax.f32 %v239_v52, 0.0  ;;  %v427_v50 = vmax.f32 %v352_v35, 0.0  ;;  %v356_v51 = vadd.f32 %v355_v14, %v2391_v58 }
 0x119   :  { %v428_v10 = vmax.f32 %v241_v2, 0.0  ;;  %1019 = vmatprep.subr.bf16.mxu0 %v2253_v42  ;;  %v430_v57 = vmax.f32 %v354_v13, 0.0 }
 0x11a   :  { %v429_v48 = vmax.f32 %v243_v5, 0.0  ;;  %v431_v59 = vmax.f32 %v356_v51, 0.0 }
 0x11b   :  { %v480_v53 = vpack.c.bf16 %v428_v10, %v424_v7  ;;  %v2432_v42 = vpack.c.bf16 %v430_v57, %v426_v11 }
 0x11c   :  { %v481_v26 = vpack.c.bf16 %v429_v48, %v425_v41  ;;  %1020 = vmatpush1.bf16.msra.mxu0 %v2257_v44  ;;  %v246_v37 = vpop.f32.mrb[12].mxu0  ;;  %v2435_v1 = vpack.c.bf16 %v431_v59, %v427_v50  ;;  %v359_v2 = vpop.f32.mrb[12].mxu1 }
 0x11d   :  { %v247_v56 = vadd.f32 %v246_v37, %v2379_v45  ;;  %v248_v55 = vpop.f32.mrb[13].mxu0  ;;  %1021 = vmatprep.subr.bf16.mxu0 %v2260_v46  ;;  %v360_v44 = vadd.f32 %v359_v2, %v2388_v54  ;;  %v361_v4 = vpop.f32.mrb[13].mxu1 }
 0x11e   :  { %v249_v52 = vadd.f32 %v248_v55, %v2384_v49  ;;  %v250_v62 = vpop.f32.mrb[14].mxu0  ;;  %952 = vmatprep.mubr.bf16.mxu0 %v481_v26  ;;  %v362_v46 = vadd.f32 %v361_v4, %v2391_v58  ;;  %v363_v35 = vpop.f32.mrb[14].mxu1 }
 0x11f   :  { %v251_v3 = vadd.f32 %v250_v62, %v2379_v45  ;;  %v252_v30 = vpop.f32.mrb[15].mxu0  ;;  %953 = vmatmul.mubr.bf16.gmra.mrb[40].mxu0 %v480_v53  ;;  %v432_v6 = vmax.f32 %v247_v56, 0.0  ;;  %v434_v10 = vmax.f32 %v360_v44, 0.0  ;;  %v364_v11 = vadd.f32 %v363_v35, %v2388_v54  ;;  %v365_v13 = vpop.f32.mrb[15].mxu1 }
 0x120   :  { %v253_v5 = vadd.f32 %v252_v30, %v2384_v49  ;;  %1022 = vmatpush1.bf16.msra.mxu0 %v2263_v47  ;;  %v433_v14 = vmax.f32 %v249_v52, 0.0  ;;  %v435_v48 = vmax.f32 %v362_v46, 0.0  ;;  %v366_v50 = vadd.f32 %v365_v13, %v2391_v58 }
 0x121   :  { %v436_v7 = vmax.f32 %v251_v3, 0.0  ;;  %1023 = vmatprep.subr.bf16.mxu0 %v2302_v8  ;;  %v438_v53 = vmax.f32 %v364_v11, 0.0 }
 0x122   :  { %v437_v41 = vmax.f32 %v253_v5, 0.0  ;;  %v439_v26 = vmax.f32 %v366_v50, 0.0 }
 0x123   :  { %v484_v51 = vpack.c.bf16 %v436_v7, %v432_v6  ;;  %v2447_v59 = vpack.c.bf16 %v438_v53, %v434_v10 }
 0x124   :  { %v485_v57 = vpack.c.bf16 %v437_v41, %v433_v14  ;;  %1024 = vmatpush1.bf16.msra.mxu0 %v2304_v9  ;;  %v256_v47 = vpop.f32.mrb[16].mxu0  ;;  %v2451_v55 = vpack.c.bf16 %v439_v26, %v435_v48  ;;  %v369_v62 = vpop.f32.mrb[16].mxu1 }
 0x125   :  { %v257_v37 = vadd.f32 %v256_v47, %v2379_v45  ;;  %v258_v8 = vpop.f32.mrb[17].mxu0  ;;  %1025 = vmatprep.subr.bf16.mxu0 %v2308_v0  ;;  %v370_v9 = vadd.f32 %v369_v62, %v2388_v54  ;;  %v371_v30 = vpop.f32.mrb[17].mxu1 }
 0x126   :  { %v259_v56 = vadd.f32 %v258_v8, %v2384_v49  ;;  %v260_v52 = vpop.f32.mrb[18].mxu0  ;;  %962 = vmatprep.mubr.bf16.mxu0 %v485_v57  ;;  %v372_v4 = vadd.f32 %v371_v30, %v2391_v58  ;;  %v373_v0 = vpop.f32.mrb[18].mxu1 }
 0x127   :  { %v261_v2 = vadd.f32 %v260_v52, %v2379_v45  ;;  %v262_v3 = vpop.f32.mrb[19].mxu0  ;;  %963 = vmatmul.mubr.bf16.gmra.mrb[44].mxu0 %v484_v51  ;;  %v440_v5 = vmax.f32 %v257_v37, 0.0  ;;  %v442_v35 = vmax.f32 %v370_v9, 0.0  ;;  %v374_v6 = vadd.f32 %v373_v0, %v2388_v54  ;;  %v375_v7 = vpop.f32.mrb[19].mxu1 }
 0x128   :  { %v263_v44 = vadd.f32 %v262_v3, %v2384_v49  ;;  %1026 = vmatpush1.bf16.msra.mxu0 %v2310_v12  ;;  %v441_v10 = vmax.f32 %v259_v56, 0.0  ;;  %v443_v13 = vmax.f32 %v372_v4, 0.0  ;;  %v376_v14 = vadd.f32 %v375_v7, %v2391_v58 }
 0x129   :  { %v444_v46 = vmax.f32 %v261_v2, 0.0  ;;  %1027 = vmatprep.subr.bf16.mxu0 %v2314_v15  ;;  %v446_v48 = vmax.f32 %v374_v6, 0.0 }
 0x12a   :  { %v445_v11 = vmax.f32 %v263_v44, 0.0  ;;  %v447_v51 = vmax.f32 %v376_v14, 0.0 }
 0x12b   :  { %v488_v41 = vpack.c.bf16 %v444_v46, %v440_v5  ;;  %v490_v53 = vpack.c.bf16 %v446_v48, %v442_v35 }
 0x12c   :  { %v489_v50 = vpack.c.bf16 %v445_v11, %v441_v10  ;;  %1028 = vmatpush1.bf16.msra.mxu0 %v2316_v16  ;;  %v266_v12 = vpop.f32.mrb[20].mxu0  ;;  %v491_v26 = vpack.c.bf16 %v447_v51, %v443_v13  ;;  %v379_v8 = vpop.f32.mrb[20].mxu1 }
 0x12d   :  { %v267_v57 = vadd.f32 %v266_v12, %v2379_v45  ;;  %v268_v47 = vpop.f32.mrb[21].mxu0  ;;  %1029 = vmatprep.subr.bf16.mxu0 %v2321_v17  ;;  %v380_v52 = vadd.f32 %v379_v8, %v2388_v54  ;;  %v381_v2 = vpop.f32.mrb[21].mxu1 }
 0x12e   :  { %v269_v15 = vadd.f32 %v268_v47, %v2384_v49  ;;  %v270_v37 = vpop.f32.mrb[22].mxu0  ;;  %972 = vmatprep.mubr.bf16.mxu0 %v489_v50  ;;  %v382_v9 = vadd.f32 %v381_v2, %v2391_v58  ;;  %v383_v17 = vpop.f32.mrb[22].mxu1  ;;  %1085 = vmatprep.mubr.bf16.mxu1 %v491_v26 }
 0x12f   :  { %v271_v56 = vadd.f32 %v270_v37, %v2379_v45  ;;  %v272_v62 = vpop.f32.mrb[23].mxu0  ;;  %973 = vmatmul.mubr.bf16.gmra.mrb[48].mxu0 %v488_v41  ;;  %v448_v3 = vmax.f32 %v267_v57, 0.0  ;;  %v450_v44 = vmax.f32 %v380_v52, 0.0  ;;  %v384_v4 = vadd.f32 %v383_v17, %v2388_v54  ;;  %v385_v0 = vpop.f32.mrb[23].mxu1  ;;  %1086 = vmatmul.mubr.bf16.vlgmr.msra.gmra.mrb[32].mxu1 %v490_v53 }
 0x130   :  { %v273_v16 = vadd.f32 %v272_v62, %v2384_v49  ;;  %1030 = vmatpush1.bf16.msra.mxu0 %v2323_v18  ;;  %v449_v5 = vmax.f32 %v269_v15, 0.0  ;;  %v451_v35 = vmax.f32 %v382_v9, 0.0  ;;  %v386_v6 = vadd.f32 %v385_v0, %v2391_v58 }
 0x131   :  { %v452_v30 = vmax.f32 %v271_v56, 0.0  ;;  %1031 = vmatprep.subr.bf16.mxu0 %v2327_v19  ;;  %v454_v10 = vmax.f32 %v384_v4, 0.0 }
 0x132   :  { %v453_v46 = vmax.f32 %v273_v16, 0.0  ;;  %v455_v18 = vmax.f32 %v386_v6, 0.0 }
 0x133   :  { %v492_v7 = vpack.c.bf16 %v452_v30, %v448_v3  ;;  %v494_v14 = vpack.c.bf16 %v454_v10, %v450_v44 }
 0x134   :  { %v493_v11 = vpack.c.bf16 %v453_v46, %v449_v5  ;;  %1032 = vmatpush1.bf16.msra.mxu0 %v2329_v20  ;;  %v276_v13 = vpop.f32.mrb[24].mxu0  ;;  %v495_v50 = vpack.c.bf16 %v455_v18, %v451_v35  ;;  %v389_v12 = vpop.f32.mrb[24].mxu1 }
 0x135   :  { %v277_v41 = vadd.f32 %v276_v13, %v2379_v45  ;;  %v278_v48 = vpop.f32.mrb[25].mxu0  ;;  %1033 = vmatprep.subr.bf16.mxu0 %v2333_v21  ;;  %v390_v57 = vadd.f32 %v389_v12, %v2388_v54  ;;  %v391_v26 = vpop.f32.mrb[25].mxu1 }
 0x136   :  { %v279_v19 = vadd.f32 %v278_v48, %v2384_v49  ;;  %v280_v51 = vpop.f32.mrb[26].mxu0  ;;  %982 = vmatprep.mubr.bf16.mxu0 %v493_v11  ;;  %v392_v15 = vadd.f32 %v391_v26, %v2391_v58  ;;  %v393_v21 = vpop.f32.mrb[26].mxu1  ;;  %1095 = vmatprep.mubr.bf16.mxu1 %v495_v50 }
 0x137   :  { %v281_v53 = vadd.f32 %v280_v51, %v2379_v45  ;;  %v282_v47 = vpop.f32.mrb[27].mxu0  ;;  %983 = vmatmul.mubr.bf16.gmra.mrb[52].mxu0 %v492_v7  ;;  %v456_v37 = vmax.f32 %v277_v41, 0.0  ;;  %v458_v56 = vmax.f32 %v390_v57, 0.0  ;;  %v394_v52 = vadd.f32 %v393_v21, %v2388_v54  ;;  %v395_v62 = vpop.f32.mrb[27].mxu1  ;;  %1096 = vmatmul.mubr.bf16.gmra.mrb[36].mxu1 %v494_v14  ;;  %v568_v21 = vld [vmem:[%s2743_s4] sm:$0x3] }
 0x138   :  { %v283_v20 = vadd.f32 %v282_v47, %v2384_v49  ;;  %1034 = vmatpush1.bf16.msra.mxu0 %v2335_v22  ;;  %v457_v2 = vmax.f32 %v279_v19, 0.0  ;;  %v459_v9 = vmax.f32 %v392_v15, 0.0  ;;  %v396_v17 = vadd.f32 %v395_v62, %v2391_v58 }
 0x139   :  { %v460_v8 = vmax.f32 %v281_v53, 0.0  ;;  %1035 = vmatprep.subr.bf16.mxu0 %v2339_v23  ;;  %v462_v30 = vmax.f32 %v394_v52, 0.0 }
 0x13a   :  { %v461_v16 = vmax.f32 %v283_v20, 0.0  ;;  %v463_v22 = vmax.f32 %v396_v17, 0.0 }
 0x13b   :  { %v496_v3 = vpack.c.bf16 %v460_v8, %v456_v37  ;;  %v498_v0 = vpack.c.bf16 %v462_v30, %v458_v56  ;;  %v2563_v37 = vrot.slane %v568_v21, %v99_v40  ;;  %v2567_v8 = vrot.slane %v568_v21, %v103_v43 }
 0x13c   :  { %v497_v44 = vpack.c.bf16 %v461_v16, %v457_v2  ;;  %1036 = vmatpush1.bf16.msra.mxu0 %v2341_v24  ;;  %v286_v4 = vpop.f32.mrb[28].mxu0  ;;  %v499_v35 = vpack.c.bf16 %v463_v22, %v459_v9  ;;  %v399_v7 = vpop.f32.mrb[28].mxu1 }
 0x13d   :  { %v287_v5 = vadd.f32 %v286_v4, %v2379_v45  ;;  %v288_v46 = vpop.f32.mrb[29].mxu0  ;;  %1037 = vmatprep.subr.bf16.mxu0 %v2345_v25  ;;  %v400_v11 = vadd.f32 %v399_v7, %v2388_v54  ;;  %v401_v13 = vpop.f32.mrb[29].mxu1 }
 0x13e   :  { %v289_v23 = vadd.f32 %v288_v46, %v2384_v49  ;;  %v290_v6 = vpop.f32.mrb[30].mxu0  ;;  %992 = vmatprep.mubr.bf16.mxu0 %v497_v44  ;;  %v402_v14 = vadd.f32 %v401_v13, %v2391_v58  ;;  %v403_v25 = vpop.f32.mrb[30].mxu1  ;;  %1105 = vmatprep.mubr.bf16.mxu1 %v499_v35 }
 0x13f   :  { %v291_v10 = vadd.f32 %v290_v6, %v2379_v45  ;;  %v292_v18 = vpop.f32.mrb[31].mxu0  ;;  %993 = vmatmul.mubr.bf16.gmra.mrb[56].mxu0 %v496_v3  ;;  %v464_v41 = vmax.f32 %v287_v5, 0.0  ;;  %v466_v50 = vmax.f32 %v400_v11, 0.0  ;;  %v404_v19 = vadd.f32 %v403_v25, %v2388_v54  ;;  %v405_v51 = vpop.f32.mrb[31].mxu1  ;;  %1106 = vmatmul.mubr.bf16.gmra.mrb[40].mxu1 %v498_v0  ;;  %v2028_v54 = vld [vmem:[%s2744_s5 + $0x58] sm:$0xff]  }
 0x140   :  { %v293_v24 = vadd.f32 %v292_v18, %v2384_v49  ;;  %1038 = vmatpush1.bf16.msra.mxu0 %v2347_v27  ;;  %v465_v45 = vmax.f32 %v289_v23, 0.0  ;;  %v467_v53 = vmax.f32 %v402_v14, 0.0  ;;  %v406_v49 = vadd.f32 %v405_v51, %v2391_v58  ;;  %v2029_v58 = vld [vmem:[%s2744_s5 + $0x18] sm:$0xff]  }
 0x141   :  { %v468_v48 = vmax.f32 %v291_v10, 0.0  ;;  %1039 = vmatprep.subr.bf16.mxu0 %v2351_v28  ;;  %v470_v47 = vmax.f32 %v404_v19, 0.0  ;;  %v2022_v28 = vld [vmem:[%s2744_s5 + $0x40] sm:$0xff]  }
 0x142   :  { %v469_v12 = vmax.f32 %v293_v24, 0.0  ;;  %v471_v27 = vmax.f32 %v406_v49, 0.0  ;;  %1746 = vmatprep.subr.bf16.mxu1 %v2022_v28 }
 0x143   :  { %v500_v57 = vpack.c.bf16 %v468_v48, %v464_v41  ;;  %v502_v20 = vpack.c.bf16 %v470_v47, %v466_v50 }
 0x144   :  { %v501_v26 = vpack.c.bf16 %v469_v12, %v465_v45  ;;  %1040 = vmatpush1.bf16.msra.mxu0 %v2353_v29  ;;  %v503_v15 = vpack.c.bf16 %v471_v27, %v467_v53  ;;  %v2023_v29 = vld [vmem:[%s2744_s5] sm:$0xff]  }
 0x145   :  { %1041 = vmatprep.subr.bf16.mxu0 %v2357_v32  ;;  %1747 = vmatpush3.bf16.msra.mxu1 %v2023_v29  ;;  %v2024_v32 = vld [vmem:[%s2744_s5 + $0x48] sm:$0xff]  }
 0x146   :  { %1002 = vmatprep.mubr.bf16.mxu0 %v501_v26  ;;  %1115 = vmatprep.mubr.bf16.mxu1 %v503_v15 }
 0x147   :  { %1003 = vmatmul.mubr.bf16.gmra.mrb[60].mxu0 %v500_v57  ;;  %1116 = vmatmul.mubr.bf16.gmra.mrb[44].mxu1 %v502_v20 }
 0x148   :  { %1042 = vmatpush1.bf16.msra.mxu0 %v2359_v33  ;;  %1045 = vmatprep.mubr.bf16.mxu0 %v2403_v61  ;;  %v2025_v33 = vld [vmem:[%s2744_s5 + $0x8] sm:$0xff]   ;;  %v2031_v61 = vld [vmem:[%s2744_s5 + $0x20] sm:$0xff]  }
 0x149   :  { %1043 = vmatprep.subr.bf16.mxu0 %v2363_v34  ;;  %1748 = vmatprep.subr.bf16.mxu1 %v2024_v32  ;;  %v2026_v34 = vld [vmem:[%s2744_s5 + $0x50] sm:$0xff]  }
 0x14a   :  { %1749 = vmatpush3.bf16.msra.mxu1 %v2025_v33 }
 0x14b   :  { %1750 = vmatprep.subr.bf16.mxu1 %v2026_v34 }
 0x14c   :  { %1044 = vmatpush1.bf16.msra.mxu0 %v2365_v36  ;;  %v2027_v36 = vld [vmem:[%s2744_s5 + $0x10] sm:$0xff]  }
 0x14e   :  { %1751 = vmatpush3.bf16.msra.mxu1 %v2027_v36 }
 0x14f   :  { %1046 = vmatmul.mubr.bf16.vlgmr.msra.gmra.mrb[32].mxu0 %v2400_v60  ;;  %1752 = vmatprep.subr.bf16.mxu1 %v2028_v54  ;;  %v2030_v60 = vld [vmem:[%s2744_s5 + $0x60] sm:$0xff]  }
 0x150   :  { %1055 = vmatprep.mubr.bf16.mxu0 %v2419_v63  ;;  %v2033_v63 = vld [vmem:[%s2744_s5 + $0x28] sm:$0xff]  }
 0x152   :  { %1753 = vmatpush3.bf16.msra.mxu1 %v2029_v58 }
 0x153   :  { %1754 = vmatprep.subr.bf16.mxu1 %v2030_v60 }
 0x156   :  { %1755 = vmatpush3.bf16.msra.mxu1 %v2031_v61 }
 0x157   :  { %1056 = vmatmul.mubr.bf16.gmra.mrb[36].mxu0 %v2416_v31  ;;  %v2032_v31 = vld [vmem:[%s2744_s5 + $0x68] sm:$0xff]  }
 0x158   :  { %1065 = vmatprep.mubr.bf16.mxu0 %v2435_v1  ;;  %1756 = vmatprep.subr.bf16.mxu1 %v2032_v31  ;;  %v2035_v1 = vld [vmem:[%s2744_s5 + $0x30] sm:$0xff]  }
 0x15a   :  { %1757 = vmatpush3.bf16.msra.mxu1 %v2033_v63 }
 0x15f   :  { %1066 = vmatmul.mubr.bf16.gmra.mrb[40].mxu0 %v2432_v42  ;;  %v2034_v42 = vld [vmem:[%s2744_s5 + $0x70] sm:$0xff]  }
 0x160   :  { %1075 = vmatprep.mubr.bf16.mxu0 %v2451_v55  ;;  %1758 = vmatprep.subr.bf16.mxu1 %v2034_v42  ;;  %v2037_v55 = vld [vmem:[%s2744_s5 + $0x38] sm:$0xff]  }
 0x161   :  { %1759 = vmatpush3.bf16.msra.mxu1 %v2035_v1 }
 0x167   :  { %1076 = vmatmul.mubr.bf16.gmra.mrb[44].mxu0 %v2447_v59  ;;  %v2036_v59 = vld [vmem:[%s2744_s5 + $0x78] sm:$0xff]  }
 0x168   :  { %1760 = vmatprep.subr.bf16.mxu1 %v2036_v59 }
 0x169   :  { %1761 = vmatpush3.bf16.msra.mxu1 %v2037_v55 }
 0x202   :  { %v974_v56 = vpop.f32.mrb[48].mxu0  ;;  %v1087_v9 = vpop.f32.mrb[32].mxu1 }
 0x203   :  { %v975_v52 = vadd.f32 %v974_v56, %v2563_v37  ;;  %v976_v62 = vpop.f32.mrb[49].mxu0  ;;  %v1089_v44 = vpop.f32.mrb[33].mxu1 }
 0x204   :  { %v977_v2 = vadd.f32 %v976_v62, %v2567_v8  ;;  %v978_v16 = vpop.f32.mrb[50].mxu0  ;;  %v1091_v4 = vpop.f32.mrb[34].mxu1 }
 0x205   :  { %v979_v17 = vadd.f32 %v978_v16, %v2563_v37  ;;  %v1088_v3 = vadd.f32 %v1087_v9, %v975_v52  ;;  %v980_v30 = vpop.f32.mrb[51].mxu0  ;;  %v1093_v43 = vpop.f32.mrb[35].mxu1 }
 0x206   :  { %v981_v40 = vadd.f32 %v980_v30, %v2567_v8  ;;  %v1090_v22 = vadd.f32 %v1089_v44, %v977_v2 }
 0x207   :  { %v1092_v0 = vadd.f32 %v1091_v4, %v979_v17  ;;  %v1142_v46 = vmax.f32 %v1088_v3, 0.0 }
 0x208   :  { %v1094_v5 = vadd.f32 %v1093_v43, %v981_v40  ;;  %v1143_v23 = vmax.f32 %v1090_v22, 0.0 }
 0x209   :  { %v1144_v35 = vmax.f32 %v1092_v0, 0.0 }
 0x20a   :  { %v1145_v6 = vmax.f32 %v1094_v5, 0.0  ;;  %v984_v7 = vpop.f32.mrb[52].mxu0  ;;  %v1097_v25 = vpop.f32.mrb[36].mxu1 }
 0x20b   :  { %v2573_v10 = vpack.c.bf16 %v1144_v35, %v1142_v46  ;;  %v985_v11 = vadd.f32 %v984_v7, %v2563_v37  ;;  %v986_v18 = vpop.f32.mrb[53].mxu0  ;;  %v1099_v19 = vpop.f32.mrb[37].mxu1 }
 0x20c   :  { %v2576_v13 = vpack.c.bf16 %v1145_v6, %v1143_v23  ;;  %v987_v24 = vadd.f32 %v986_v18, %v2567_v8  ;;  %v988_v14 = vpop.f32.mrb[54].mxu0  ;;  %v1101_v12 = vpop.f32.mrb[38].mxu1 }
 0x20d   :  { %v989_v41 = vadd.f32 %v988_v14, %v2563_v37  ;;  %v1098_v48 = vadd.f32 %v1097_v25, %v985_v11  ;;  %v990_v50 = vpop.f32.mrb[55].mxu0  ;;  %v1103_v49 = vpop.f32.mrb[39].mxu1 }
 0x20e   :  { %v991_v51 = vadd.f32 %v990_v50, %v2567_v8  ;;  %v1100_v45 = vadd.f32 %v1099_v19, %v987_v24 }
 0x20f   :  { %v1102_v53 = vadd.f32 %v1101_v12, %v989_v41  ;;  %v1146_v47 = vmax.f32 %v1098_v48, 0.0 }
 0x210   :  { %v1104_v57 = vadd.f32 %v1103_v49, %v991_v51  ;;  %v1147_v27 = vmax.f32 %v1100_v45, 0.0 }
 0x211   :  { %v1148_v26 = vmax.f32 %v1102_v53, 0.0 }
 0x212   :  { %v1149_v20 = vmax.f32 %v1104_v57, 0.0  ;;  %v994_v15 = vpop.f32.mrb[56].mxu0  ;;  %v1107_v54 = vpop.f32.mrb[40].mxu1 }
 0x213   :  { %v2581_v28 = vpack.c.bf16 %v1148_v26, %v1146_v47  ;;  %v995_v29 = vadd.f32 %v994_v15, %v2563_v37  ;;  %v996_v32 = vpop.f32.mrb[57].mxu0  ;;  %v1109_v31 = vpop.f32.mrb[41].mxu1 }
 0x214   :  { %v2584_v33 = vpack.c.bf16 %v1149_v20, %v1147_v27  ;;  %v997_v34 = vadd.f32 %v996_v32, %v2567_v8  ;;  %v998_v36 = vpop.f32.mrb[58].mxu0  ;;  %v1111_v1 = vpop.f32.mrb[42].mxu1 }
 0x215   :  { %v999_v58 = vadd.f32 %v998_v36, %v2563_v37  ;;  %v1108_v60 = vadd.f32 %v1107_v54, %v995_v29  ;;  %v1000_v61 = vpop.f32.mrb[59].mxu0  ;;  %v1113_v55 = vpop.f32.mrb[43].mxu1 }
 0x216   :  { %v1001_v63 = vadd.f32 %v1000_v61, %v2567_v8  ;;  %v1110_v42 = vadd.f32 %v1109_v31, %v997_v34 }
 0x217   :  { %v1112_v59 = vadd.f32 %v1111_v1, %v999_v58  ;;  %v1150_v56 = vmax.f32 %v1108_v60, 0.0 }
 0x218   :  { %v1114_v21 = vadd.f32 %v1113_v55, %v1001_v63  ;;  %v1151_v62 = vmax.f32 %v1110_v42, 0.0 }
 0x219   :  { %v1152_v52 = vmax.f32 %v1112_v59, 0.0 }
 0x21a   :  { %v1153_v2 = vmax.f32 %v1114_v21, 0.0  ;;  %v1004_v16 = vpop.f32.mrb[60].mxu0  ;;  %v1117_v22 = vpop.f32.mrb[44].mxu1 }
 0x21b   :  { %v2589_v9 = vpack.c.bf16 %v1152_v52, %v1150_v56  ;;  %v1005_v17 = vadd.f32 %v1004_v16, %v2563_v37  ;;  %v1006_v3 = vpop.f32.mrb[61].mxu0  ;;  %v1119_v5 = vpop.f32.mrb[45].mxu1 }
 0x21c   :  { %v2592_v30 = vpack.c.bf16 %v1153_v2, %v1151_v62  ;;  %v1007_v44 = vadd.f32 %v1006_v3, %v2567_v8  ;;  %v1008_v40 = vpop.f32.mrb[62].mxu0  ;;  %v1121_v23 = vpop.f32.mrb[46].mxu1 }
 0x21d   :  { %v1009_v4 = vadd.f32 %v1008_v40, %v2563_v37  ;;  %v1118_v0 = vadd.f32 %v1117_v22, %v1005_v17  ;;  %v1010_v43 = vpop.f32.mrb[63].mxu0  ;;  %v1123_v7 = vpop.f32.mrb[47].mxu1 }
 0x21e   :  { %v1011_v46 = vadd.f32 %v1010_v43, %v2567_v8  ;;  %v1120_v35 = vadd.f32 %v1119_v5, %v1007_v44 }
 0x21f   :  { %v1122_v6 = vadd.f32 %v1121_v23, %v1009_v4  ;;  %v1154_v18 = vmax.f32 %v1118_v0, 0.0 }
 0x220   :  { %v1124_v11 = vadd.f32 %v1123_v7, %v1011_v46  ;;  %v1155_v14 = vmax.f32 %v1120_v35, 0.0 }
 0x221   :  { %v1156_v24 = vmax.f32 %v1122_v6, 0.0 }
 0x222   :  { %v1157_v25 = vmax.f32 %v1124_v11, 0.0  ;;  %v1047_v41 = vpop.f32.mrb[32].mxu0 }
 0x223   :  { %v2597_v48 = vpack.c.bf16 %v1156_v24, %v1154_v18  ;;  %v1842_v50 = vadd.f32 %v1047_v41, %v2563_v37  ;;  %v1049_v19 = vpop.f32.mrb[33].mxu0 }
 0x224   :  { %v2600_v51 = vpack.c.bf16 %v1157_v25, %v1155_v14  ;;  %v1843_v45 = vadd.f32 %v1049_v19, %v2567_v8  ;;  %v1051_v12 = vpop.f32.mrb[34].mxu0 }
 0x225   :  { %v1844_v53 = vadd.f32 %v1051_v12, %v2563_v37  ;;  %v1053_v49 = vpop.f32.mrb[35].mxu0  ;;  %v1126_v47 = vmax.f32 %v1842_v50, 0.0 }
 0x226   :  { %v1845_v57 = vadd.f32 %v1053_v49, %v2567_v8  ;;  %v1127_v27 = vmax.f32 %v1843_v45, 0.0 }
 0x227   :  { %v1128_v26 = vmax.f32 %v1844_v53, 0.0 }
 0x228   :  { %v1129_v20 = vmax.f32 %v1845_v57, 0.0 }
 0x229   :  { %v1158_v15 = vpack.c.bf16 %v1128_v26, %v1126_v47 }
 0x22a   :  { %v1159_v29 = vpack.c.bf16 %v1129_v20, %v1127_v27  ;;  %v1057_v32 = vpop.f32.mrb[36].mxu0 }
 0x22b   :  { %v1846_v34 = vadd.f32 %v1057_v32, %v2563_v37  ;;  %v1059_v36 = vpop.f32.mrb[37].mxu0 }
 0x22c   :  { %v1847_v54 = vadd.f32 %v1059_v36, %v2567_v8  ;;  %v1061_v58 = vpop.f32.mrb[38].mxu0  ;;  %1341 = vmatprep.mubr.bf16.mxu1 %v1159_v29 }
 0x22d   :  { %v1848_v60 = vadd.f32 %v1061_v58, %v2563_v37  ;;  %v1063_v61 = vpop.f32.mrb[39].mxu0  ;;  %1342 = vmatmul.mubr.bf16.vlgmr.msra.gmra.mrb[48].mxu1 %v1158_v15  ;;  %v1130_v63 = vmax.f32 %v1846_v34, 0.0 }
 0x22e   :  { %v1849_v31 = vadd.f32 %v1063_v61, %v2567_v8  ;;  %v1131_v1 = vmax.f32 %v1847_v54, 0.0 }
 0x22f   :  { %v1132_v42 = vmax.f32 %v1848_v60, 0.0 }
 0x230   :  { %v1133_v59 = vmax.f32 %v1849_v31, 0.0 }
 0x231   :  { %v1160_v55 = vpack.c.bf16 %v1132_v42, %v1130_v63 }
 0x232   :  { %v1161_v21 = vpack.c.bf16 %v1133_v59, %v1131_v1  ;;  %v1067_v56 = vpop.f32.mrb[40].mxu0 }
 0x233   :  { %v1850_v52 = vadd.f32 %v1067_v56, %v2563_v37  ;;  %v1069_v62 = vpop.f32.mrb[41].mxu0 }
 0x234   :  { %v1851_v2 = vadd.f32 %v1069_v62, %v2567_v8  ;;  %v1071_v16 = vpop.f32.mrb[42].mxu0  ;;  %1349 = vmatprep.mubr.bf16.mxu1 %v1161_v21 }
 0x235   :  { %v1852_v17 = vadd.f32 %v1071_v16, %v2563_v37  ;;  %v1073_v3 = vpop.f32.mrb[43].mxu0  ;;  %1350 = vmatmul.mubr.bf16.gmra.mrb[52].mxu1 %v1160_v55  ;;  %v1134_v40 = vmax.f32 %v1850_v52, 0.0 }
 0x236   :  { %v1853_v44 = vadd.f32 %v1073_v3, %v2567_v8  ;;  %v1135_v4 = vmax.f32 %v1851_v2, 0.0 }
 0x237   :  { %v1136_v22 = vmax.f32 %v1852_v17, 0.0 }
 0x238   :  { %v1137_v0 = vmax.f32 %v1853_v44, 0.0 }
 0x239   :  { %v1162_v43 = vpack.c.bf16 %v1136_v22, %v1134_v40 }
 0x23a   :  { %v1163_v5 = vpack.c.bf16 %v1137_v0, %v1135_v4  ;;  %v1077_v46 = vpop.f32.mrb[44].mxu0 }
 0x23b   :  { %v1854_v35 = vadd.f32 %v1077_v46, %v2563_v37  ;;  %v1079_v23 = vpop.f32.mrb[45].mxu0 }
 0x23c   :  { %v1855_v6 = vadd.f32 %v1079_v23, %v2567_v8  ;;  %v1081_v7 = vpop.f32.mrb[46].mxu0  ;;  %1357 = vmatprep.mubr.bf16.mxu1 %v1163_v5 }
 0x23d   :  { %v1856_v11 = vadd.f32 %v1081_v7, %v2563_v37  ;;  %v1083_v18 = vpop.f32.mrb[47].mxu0  ;;  %1358 = vmatmul.mubr.bf16.gmra.mrb[56].mxu1 %v1162_v43  ;;  %v1138_v14 = vmax.f32 %v1854_v35, 0.0 }
 0x23e   :  { %v1857_v24 = vadd.f32 %v1083_v18, %v2567_v8  ;;  %v1139_v41 = vmax.f32 %v1855_v6, 0.0 }
 0x23f   :  { %v1140_v25 = vmax.f32 %v1856_v11, 0.0 }
 0x240   :  { %v1141_v50 = vmax.f32 %v1857_v24, 0.0 }
 0x241   :  { %v1164_v19 = vpack.c.bf16 %v1140_v25, %v1138_v14 }
 0x242   :  { %v1165_v45 = vpack.c.bf16 %v1141_v50, %v1139_v41 }
 0x244   :  { %1365 = vmatprep.mubr.bf16.mxu1 %v1165_v45 }
 0x245   :  { %1366 = vmatmul.mubr.bf16.gmra.mrb[60].mxu1 %v1164_v19 }
 0x246   :  { %1373 = vmatprep.mubr.bf16.mxu1 %v2576_v13  ;;  %v2628_v13 = vld [vmem:[%s2745_s6] ss:$0 sm:$0xff] }
 0x24d   :  { %1374 = vmatmul.mubr.bf16.gmra.mrb[64].mxu1 %v2573_v10 }
 0x24e   :  { %1381 = vmatprep.mubr.bf16.mxu1 %v2584_v33 }
 0x255   :  { %1382 = vmatmul.mubr.bf16.gmra.mrb[68].mxu1 %v2581_v28 }
 0x256   :  { %1389 = vmatprep.mubr.bf16.mxu1 %v2592_v30 }
 0x25d   :  { %1390 = vmatmul.mubr.bf16.gmra.mrb[72].mxu1 %v2589_v9  ;;  %v2634_v9 = vld [vmem:[%s2746_s7] ss:$0 sm:$0xff] }
 0x25e   :  { %1397 = vmatprep.mubr.bf16.mxu1 %v2600_v51 }
 0x265   :  { %1398 = vmatmul.mubr.bf16.gmra.mrb[76].mxu1 %v2597_v48 }
 0x300   :  { %v1762_v37 = vpop.f32.mrb[48].mxu1 }
 0x301   :  { %v1763_v8 = vpop.f32.mrb[49].mxu1 }
 0x302   :  { %v1764_v10 = vadd.f32 %v1763_v8, %v1762_v37  ;;  %v1765_v12 = vpop.f32.mrb[50].mxu1 }
 0x303   :  { %v1766_v33 = vpop.f32.mrb[51].mxu1 }
 0x304   :  { %v1767_v53 = vadd.f32 %v1766_v33, %v1765_v12  ;;  %v1344_v28 = vadd.f32 %v1764_v10, %v2628_v13 }
 0x306   :  { %v1347_v30 = vadd.f32 %v1767_v53, %v2628_v13  ;;  %v1406_v48 = vmax.f32 %v1344_v28, 0.0 }
 0x308   :  { %v1407_v51 = vmax.f32 %v1347_v30, 0.0  ;;  %v1768_v49 = vpop.f32.mrb[52].mxu1  ;;  %v1429_v57 = vmul.f32 %v2634_v9, %v1406_v48 }
 0x309   :  { %v1769_v47 = vpop.f32.mrb[53].mxu1 }
 0x30a   :  { %v1770_v26 = vadd.f32 %v1769_v47, %v1768_v49  ;;  %v1771_v27 = vpop.f32.mrb[54].mxu1  ;;  %1445 = vadd.xlane.f32.xlu0 %v1429_v57  ;;  %v1430_v29 = vmul.f32 %v2634_v9, %v1407_v51 }
 0x30b   :  { %v1772_v20 = vpop.f32.mrb[55].mxu1 }
 0x30c   :  { %v1773_v15 = vadd.f32 %v1772_v20, %v1771_v27  ;;  %v1352_v32 = vadd.f32 %v1770_v26, %v2628_v13 }
 0x30e   :  { %v1355_v34 = vadd.f32 %v1773_v15, %v2628_v13  ;;  %1447 = vadd.xlane.f32.xlu0 %v1430_v29  ;;  %v1408_v36 = vmax.f32 %v1352_v32, 0.0 }
 0x310   :  { %v1409_v54 = vmax.f32 %v1355_v34, 0.0  ;;  %v1774_v58 = vpop.f32.mrb[56].mxu1  ;;  %v1431_v60 = vmul.f32 %v2634_v9, %v1408_v36 }
 0x311   :  { %v1775_v61 = vpop.f32.mrb[57].mxu1 }
 0x312   :  { %v1776_v31 = vadd.f32 %v1775_v61, %v1774_v58  ;;  %v1777_v63 = vpop.f32.mrb[58].mxu1  ;;  %1449 = vadd.xlane.f32.xlu1 %v1431_v60  ;;  %v1432_v55 = vmul.f32 %v2634_v9, %v1409_v54 }
 0x313   :  { %v1778_v42 = vpop.f32.mrb[59].mxu1 }
 0x314   :  { %v1360_v1 = vadd.f32 %v1776_v31, %v2628_v13  ;;  %v1779_v59 = vadd.f32 %v1778_v42, %v1777_v63 }
 0x316   :  { %v1410_v21 = vmax.f32 %v1360_v1, 0.0  ;;  %v1363_v56 = vadd.f32 %v1779_v59, %v2628_v13  ;;  %1451 = vadd.xlane.f32.xlu1 %v1432_v55 }
 0x318   :  { %v1411_v52 = vmax.f32 %v1363_v56, 0.0  ;;  %v1780_v62 = vpop.f32.mrb[60].mxu1  ;;  %v1433_v2 = vmul.f32 %v2634_v9, %v1410_v21 }
 0x319   :  { %v1781_v16 = vpop.f32.mrb[61].mxu1 }
 0x31a   :  { %v1782_v17 = vadd.f32 %v1781_v16, %v1780_v62  ;;  %v1783_v3 = vpop.f32.mrb[62].mxu1  ;;  %1453 = vadd.xlane.f32.xlu0 %v1433_v2  ;;  %v1434_v44 = vmul.f32 %v2634_v9, %v1411_v52 }
 0x31b   :  { %v1784_v40 = vpop.f32.mrb[63].mxu1 }
 0x31c   :  { %v1368_v22 = vadd.f32 %v1782_v17, %v2628_v13  ;;  %v1785_v4 = vadd.f32 %v1784_v40, %v1783_v3  ;;  %1455 = vadd.xlane.f32.xlu1 %v1434_v44  ;;  %v2668_v3 = vand.u32 127, %v97_v38 }
 0x31e   :  { %v1412_v0 = vmax.f32 %v1368_v22, 0.0  ;;  %v1371_v43 = vadd.f32 %v1785_v4, %v2628_v13  ;;  %v1517_v44 = vadd.s32 4294967288, %v2668_v3  ;;  %v1524_v22 = vadd.s32 4294967280, %v2668_v3 }
 0x31f   :  { %v1531_v4 = vadd.s32 4294967272, %v2668_v3 }
 0x320   :  { %v1413_v5 = vmax.f32 %v1371_v43, 0.0  ;;  %v1786_v46 = vpop.f32.mrb[64].mxu1  ;;  %v1435_v35 = vmul.f32 %v2634_v9, %v1412_v0  ;;  %v1520_v43 = vsub.s32 %v1517_v44, %v2370_v39 }
 0x321   :  { %v1787_v23 = vpop.f32.mrb[65].mxu1 }
 0x322   :  { %v1788_v6 = vadd.f32 %v1787_v23, %v1786_v46  ;;  %1457 = vadd.xlane.f32.xlu0 %v1435_v35  ;;  %v1789_v7 = vpop.f32.mrb[66].mxu1  ;;  %v1436_v11 = vmul.f32 %v2634_v9, %v1413_v5  ;;  %v1515_v46 = vsub.s32 %v2668_v3, %v2370_v39  ;;  %v1527_v35 = vsub.s32 %v1524_v22, %v2370_v39 }
 0x323   :  { %v1790_v18 = vpop.f32.mrb[67].mxu1 }
 0x324   :  { %v1376_v24 = vadd.f32 %v1788_v6, %v2628_v13  ;;  %v1791_v14 = vadd.f32 %v1790_v18, %v1789_v7  ;;  %1459 = vadd.xlane.f32.xlu1 %v1436_v11  ;;  %v1534_v7 = vsub.s32 %v1531_v4, %v2370_v39  ;;  %v1545_v18 = vadd.s32 4294967256, %v2668_v3 }
 0x325   :  { %v1601_v4 = vadd.s32 4294967192, %v2668_v3 }
 0x326   :  { %v1414_v25 = vmax.f32 %v1376_v24, 0.0  ;;  %v1379_v41 = vadd.f32 %v1791_v14, %v2628_v13 }
 0x328   :  { %v1415_v50 = vmax.f32 %v1379_v41, 0.0  ;;  %v1792_v19 = vpop.f32.mrb[68].mxu1  ;;  %v1437_v45 = vmul.f32 %v2634_v9, %v1414_v25  ;;  %v1552_v41 = vadd.s32 4294967248, %v2668_v3 }
 0x329   :  { %v1793_v37 = vpop.f32.mrb[69].mxu1 }
 0x32a   :  { %v1794_v8 = vadd.f32 %v1793_v37, %v1792_v19  ;;  %v1795_v10 = vpop.f32.mrb[70].mxu1  ;;  %1461 = vadd.xlane.f32.xlu0 %v1437_v45  ;;  %v1438_v12 = vmul.f32 %v2634_v9, %v1415_v50  ;;  %v1559_v37 = vadd.s32 4294967240, %v2668_v3 }
 0x32b   :  { %v1796_v33 = vpop.f32.mrb[71].mxu1 }
 0x32c   :  { %v1384_v53 = vadd.f32 %v1794_v8, %v2628_v13  ;;  %v1797_v28 = vadd.f32 %v1796_v33, %v1795_v10  ;;  %1463 = vadd.xlane.f32.xlu1 %v1438_v12  ;;  %v1548_v12 = vsub.s32 %v1545_v18, %v2370_v39 }
 0x32e   :  { %v1416_v30 = vmax.f32 %v1384_v53, 0.0  ;;  %v1387_v48 = vadd.f32 %v1797_v28, %v2628_v13  ;;  %v1555_v28 = vsub.s32 %v1552_v41, %v2370_v39 }
 0x330   :  { %v1417_v51 = vmax.f32 %v1387_v48, 0.0  ;;  %v1798_v49 = vpop.f32.mrb[72].mxu1  ;;  %v1439_v57 = vmul.f32 %v2634_v9, %v1416_v30 }
 0x331   :  { %v1799_v47 = vpop.f32.mrb[73].mxu1 }
 0x332   :  { %v1800_v26 = vadd.f32 %v1799_v47, %v1798_v49  ;;  %v1801_v27 = vpop.f32.mrb[74].mxu1  ;;  %1465 = vadd.xlane.f32.xlu0 %v1439_v57  ;;  %v1440_v20 = vmul.f32 %v2634_v9, %v1417_v51  ;;  %v1566_v51 = vadd.s32 4294967232, %v2668_v3 }
 0x333   :  { %v1802_v15 = vpop.f32.mrb[75].mxu1 }
 0x334   :  { %v1392_v29 = vadd.f32 %v1800_v26, %v2628_v13  ;;  %v1803_v32 = vadd.f32 %v1802_v15, %v1801_v27  ;;  %1467 = vadd.xlane.f32.xlu1 %v1440_v20  ;;  %v1562_v26 = vsub.s32 %v1559_v37, %v2370_v39  ;;  %v1573_v27 = vadd.s32 4294967224, %v2668_v3 }
 0x336   :  { %v1418_v34 = vmax.f32 %v1392_v29, 0.0  ;;  %v1395_v36 = vadd.f32 %v1803_v32, %v2628_v13  ;;  %v1580_v32 = vadd.s32 4294967216, %v2668_v3 }
 0x338   :  { %v1419_v54 = vmax.f32 %v1395_v36, 0.0  ;;  %v1804_v58 = vpop.f32.mrb[76].mxu1  ;;  %v1441_v60 = vmul.f32 %v2634_v9, %v1418_v34 }
 0x339   :  { %v1805_v61 = vpop.f32.mrb[77].mxu1 }
 0x33a   :  { %v1806_v31 = vadd.f32 %v1805_v61, %v1804_v58  ;;  %v1807_v63 = vpop.f32.mrb[78].mxu1  ;;  %1469 = vadd.xlane.f32.xlu0 %v1441_v60  ;;  %v1442_v42 = vmul.f32 %v2634_v9, %v1419_v54  ;;  %v1569_v54 = vsub.s32 %v1566_v51, %v2370_v39 }
 0x33b   :  { %v1808_v1 = vpop.f32.mrb[79].mxu1 }
 0x33c   :  { %v1400_v59 = vadd.f32 %v1806_v31, %v2628_v13  ;;  %v1809_v55 = vadd.f32 %v1808_v1, %v1807_v63  ;;  %1471 = vadd.xlane.f32.xlu1 %v1442_v42  ;;  %v1576_v31 = vsub.s32 %v1573_v27, %v2370_v39  ;;  %v1587_v63 = vadd.s32 4294967208, %v2668_v3 }
 0x33e   :  { %v1420_v21 = vmax.f32 %v1400_v59, 0.0  ;;  %v1403_v56 = vadd.f32 %v1809_v55, %v2628_v13  ;;  %v2676_v13 = vstv %s2747_s8  ;;  %v1583_v55 = vsub.s32 %v1580_v32, %v2370_v39  ;;  %s2117_s8 = smov [#allocation8]  }
 0x33f   :  { %s1630_s10 = sshll.u32 %s2117_s8, 4  ;;  %s1631_s10 = int_to_ptr.vmem [resolvable:$true] %s1630_s10 }
 0x340   :  { %v1421_v52 = vmax.f32 %v1403_v56, 0.0  ;;  %v1443_v62 = vmul.f32 %v2634_v9, %v1420_v21  ;;  %s2082_s13 = scalar_lea.vmem %s1631_s10, 16  ;;  %s2086_s14 = scalar_lea.vmem %s1631_s10, 32 }
 0x341   :  { %p2083_p2 = scmp.ne.s32.totalorder %s1631_s10, %s2082_s13  ;;  %p2087_p3 = scmp.lt.s32.totalorder %s1631_s10, %s1631_s10 }
 0x342   :  { %1473 = vadd.xlane.f32.xlu0 %v1443_v62  ;;  %v1444_v2 = vmul.f32 %v2634_v9, %v1421_v52  ;;  %v1538_v9 = vadd.s32 4294967264, %v2668_v3  ;;  %p2088_p4 = scmp.lt.s32.totalorder %s2086_s14, %s2082_s13 }
 0x344   :  { %1475 = vadd.xlane.f32.xlu1 %v1444_v2  ;;  %v1541_v24 = vsub.s32 %v1538_v9, %v2370_v39  ;;  %v1594_v2 = vadd.s32 4294967200, %v2668_v3  ;;  %p2089_p5 = por %p2088_p4, %p2087_p3 }
 0x346   :  { %p2090_p6 = pnand %p2089_p5, %p2083_p2 }
 0x397   :  { %v1446_v16 = vpop.xlane.xlu0 %1445 }
 0x398   :  { %v1479_v6 = vadd.f32 %v2676_v13, %v1446_v16  ;;  %v1590_v16 = vsub.s32 %v1587_v63, %v2370_v39 }
 0x39a   :  { %v1516_v8 = vrot.slane %v1479_v6, %v1515_v46  ;;  %v1608_v46 = vadd.s32 4294967184, %v2668_v3  ;;  %v1604_v6 = vsub.s32 %v1601_v4, %v2370_v39 }
 0x39b   :  { %v1448_v40 = vpop.xlane.xlu0 %1447 }
 0x39c   :  { %v1480_v38 = vadd.f32 %v2676_v13, %v1448_v40 }
 0x39e   :  { %v1521_v50 = vrot.slane %v1480_v38, %v1520_v43  ;;  %v1597_v43 = vsub.s32 %v1594_v2, %v2370_v39 }
 0x39f   :  { %v1450_v17 = vpop.xlane.xlu1 %1449 }
 0x3a0   :  { %v1481_v23 = vadd.f32 %v2676_v13, %v1450_v17  ;;  %v1523_v49 = vsel %vm1522_vm1, %v1521_v50, %v1516_v8 }
 0x3a2   :  { %v1528_v45 = vrot.slane %v1481_v23, %v1527_v35 }
 0x3a3   :  { %v1452_v0 = vpop.xlane.xlu1 %1451 }
 0x3a4   :  { %v1482_v11 = vadd.f32 %v2676_v13, %v1452_v0  ;;  %v1530_v47 = vsel %vm1529_vm2, %v1528_v45, %v1523_v49 }
 0x3a6   :  { %v1535_v10 = vrot.slane %v1482_v11, %v1534_v7 }
 0x3a7   :  { %v1454_v5 = vpop.xlane.xlu0 %1453 }
 0x3a8   :  { %v1483_v14 = vadd.f32 %v2676_v13, %v1454_v5  ;;  %v1537_v20 = vsel %vm1536_vm3, %v1535_v10, %v1530_v47 }
 0x3a9   :  { %v1456_v25 = vpop.xlane.xlu1 %1455 }
 0x3aa   :  { %v1484_v33 = vadd.f32 %v2676_v13, %v1456_v25  ;;  %v1542_v53 = vrot.slane %v1483_v14, %v1541_v24  ;;  %v1615_v24 = vadd.s32 4294967176, %v2668_v3  ;;  %v1611_v14 = vsub.s32 %v1608_v46, %v2370_v39 }
 0x3ac   :  { %v1549_v15 = vrot.slane %v1484_v33, %v1548_v12  ;;  %v1544_v34 = vsel %vm1543_vm4, %v1542_v53, %v1537_v20  ;;  %v1618_v37 = vsub.s32 %v1615_v24, %v2370_v39 }
 0x3ae   :  { %v1551_v42 = vsel %vm1550_vm5, %v1549_v15, %v1544_v34 }
 0x3af   :  { %v1458_v19 = vpop.xlane.xlu0 %1457 }
 0x3b0   :  { %v1485_v30 = vadd.f32 %v2676_v13, %v1458_v19 }
 0x3b1   :  { %v1460_v48 = vpop.xlane.xlu1 %1459 }
 0x3b2   :  { %v1486_v29 = vadd.f32 %v2676_v13, %v1460_v48  ;;  %v1556_v36 = vrot.slane %v1485_v30, %v1555_v28 }
 0x3b4   :  { %v1563_v1 = vrot.slane %v1486_v29, %v1562_v26  ;;  %v1558_v21 = vsel %vm1557_vm6, %v1556_v36, %v1551_v42 }
 0x3b6   :  { %v1565_v17 = vsel %vm1564_vm7, %v1563_v1, %v1558_v21 }
 0x3b7   :  { %v1462_v57 = vpop.xlane.xlu0 %1461 }
 0x3b8   :  { %v1487_v58 = vadd.f32 %v2676_v13, %v1462_v57 }
 0x3b9   :  { %v1464_v60 = vpop.xlane.xlu1 %1463 }
 0x3ba   :  { %v1488_v59 = vadd.f32 %v2676_v13, %v1464_v60  ;;  %v1570_v56 = vrot.slane %v1487_v58, %v1569_v54 }
 0x3bc   :  { %v1577_v44 = vrot.slane %v1488_v59, %v1576_v31  ;;  %v1572_v0 = vsel %vm1571_vm8, %v1570_v56, %v1565_v17 }
 0x3be   :  { %v1579_v35 = vsel %vm1578_vm9, %v1577_v44, %v1572_v0 }
 0x3bf   :  { %v1466_v61 = vpop.xlane.xlu0 %1465 }
 0x3c0   :  { %v1489_v52 = vadd.f32 %v2676_v13, %v1466_v61 }
 0x3c1   :  { %v1468_v62 = vpop.xlane.xlu1 %1467 }
 0x3c2   :  { %v1490_v40 = vadd.f32 %v2676_v13, %v1468_v62  ;;  %v1584_v9 = vrot.slane %v1489_v52, %v1583_v55 }
 0x3c4   :  { %v1591_v23 = vrot.slane %v1490_v40, %v1590_v16  ;;  %v1586_v11 = vsel %vm1585_vm10, %v1584_v9, %v1579_v35 }
 0x3c6   :  { %v1593_v25 = vsel %vm1592_vm11, %v1591_v23, %v1586_v11 }
 0x3c7   :  { %v1470_v22 = vpop.xlane.xlu0 %1469 }
 0x3c8   :  { %v1491_v38 = vadd.f32 %v2676_v13, %v1470_v22 }
 0x3c9   :  { %v1472_v5 = vpop.xlane.xlu1 %1471 }
 0x3ca   :  { %v1492_v7 = vadd.f32 %v2676_v13, %v1472_v5  ;;  %v1598_v18 = vrot.slane %v1491_v38, %v1597_v43 }
 0x3cc   :  { %v1605_v41 = vrot.slane %v1492_v7, %v1604_v6  ;;  %v1600_v19 = vsel %vm1599_vm12, %v1598_v18, %v1593_v25 }
 0x3ce   :  { %v1607_v3 = vsel %vm1606_vm13, %v1605_v41, %v1600_v19 }
 0x3cf   :  { %v1474_v50 = vpop.xlane.xlu0 %1473 }
 0x3d0   :  { %v1493_v45 = vadd.f32 %v2676_v13, %v1474_v50 }
 0x3d1   :  { %v1476_v8 = vpop.xlane.xlu1 %1475 }
 0x3d2   :  { %v1612_v10 = vrot.slane %v1493_v45, %v1611_v14  ;;  %v1494_v12 = vadd.f32 %v2676_v13, %v1476_v8 }
 0x3d4   :  { %v1619_v33 = vrot.slane %v1494_v12, %v1618_v37  ;;  %v1614_v53 = vsel %vm1613_vm14, %v1612_v10, %v1607_v3 }
 0x3d6   :  { %v1621_v28 = vsel %vm1620_vm15, %v1619_v33, %v1614_v53 }
 0x3d7   :  { %1623 = vst [vmem:[#allocation8] sm:$0x1] %v1621_v28 }
 0x3d8   :  { %2093 = shalt.err (!%p2090_p6)
}
 0x3d9   :  { %s2094_s16 = scalar_lea.hbm %s2748_s9, 16 }
 0x3da   :  { %p2095_p7 = scmp.ne.s32.totalorder %s2748_s9, %s2094_s16  ;;  %p2098_p8 = scmp.lt.u32.totalorder %s2094_s16, %s2748_s9 }
 0x3dc   :  { %p2100_p9 = pnand %p2098_p8, %p2095_p7 }
 0x3de   :  { %2103 = shalt.err (!%p2100_p9)
}
 0x3df   :  { %1633 = dma.vmem_to_hbm [thread:$0]  %s1631_s10, 16, %s2748_s9, [#allocation5]  }
 0x3e0   :  { %2108 = dma.done.wait [#allocation5], 16  }
 0x3e1   :  { %2109 = vsyncadd [#allocation5], 4294967280 }
 0x3e2   :  { %1637 = vsyncpa [#allocation4], 1 }
 0x3e3   :  { %1638 = vsyncpa [#allocation7], 1 }
 0x3e4   :  { %1639 = vsyncpa [#allocation5], 1 }

</bundles_post_ra>
